<compile_context>
chip_gen: v7x
topology: tpu7x:2x2x1
jax: 0.10.0
libtpu: 0.0.40
codegen_flags: <defaults>
</compile_context>

<pallas_src>
import jax
import jax.numpy as jnp
from jax.experimental import pallas as pl
from jax.experimental.pallas import tpu as pltpu

IGNORE_ID = -1

# ---- model config (small synthetic sizes consistent with the module) ----
VOCAB = 256       # vocab_size
HIDDEN = 128      # decoder.hidden_size
N_LAYERS = 2
N_HEAD = 4
HEAD_DIM = 32     # N_HEAD * HEAD_DIM == HIDDEN
HALF = HEAD_DIM // 2
FFN = 256
B, T = 2, 16


# ----------------------------------------------------------------------
# Fused decoder-layer kernel (one grid step per batch element)
# ----------------------------------------------------------------------
def _layer_kernel(len_ref,                                   # (B,) int32, scalar prefetch (SMEM)
                  x_ref, cosf_ref, sinf_ref, rot_ref,        # activations / RoPE tables
                  an_ref, wqkv_ref, wo_ref,                  # attention block params
                  fn_ref, wg_ref, wu_ref, wd_ref,            # FFN block params
                  o_ref):
    b = pl.program_id(0)
    Tq = x_ref.shape[1]
    H = x_ref.shape[2]
    Dh = HEAD_DIM
    n_head = H // Dh
    scale = 1.0 / float(Dh) ** 0.5

    x = x_ref[0].astype(jnp.float32)                         # (T, H) residual stream (f32)

    # ---- pre-attention RMSNorm fused with the QKV projection (bf16 MXU operands) ----
    var = jnp.mean(x * x, axis=-1, keepdims=True)
    h = x * jax.lax.rsqrt(var + 1e-6) * an_ref[...]
    qkv = jnp.dot(h.astype(jnp.bfloat16), wqkv_ref[...],
                  preferred_element_type=jnp.float32)        # (T, 3H) f32

    # ---- causal + padding mask built in-kernel from text_length ----
    L = len_ref[b]
    row = jax.lax.broadcasted_iota(jnp.int32, (Tq, Tq), 0)
    col = jax.lax.broadcasted_iota(jnp.int32, (Tq, Tq), 1)
    keep = (col <= row) & (col < L)

    # ---- RoPE on all heads at once: full-width (T, H) cos/sin, block-diag rotate-half ----
    cosf = cosf_ref[...]                                      # (T, H)  per-head [cos, cos] tiled
    sinf = sinf_ref[...]                                      # (T, H)  per-head [sin, sin] tiled
    rot = rot_ref[...]                                        # (H, H)  block-diag rotate-half

    q_lin = qkv[:, 0 * H:1 * H]
    k_lin = qkv[:, 1 * H:2 * H]
    q_all = q_lin * cosf + jnp.dot(q_lin, rot, preferred_element_type=jnp.float32) * sinf
    k_all = k_lin * cosf + jnp.dot(k_lin, rot, preferred_element_type=jnp.float32) * sinf

    # ---- per-head masked attention; output projection accumulated head-by-head ----
    attn_proj = jnp.zeros((Tq, H), jnp.float32)
    for hd in range(n_head):
        q = q_all[:, hd * Dh:(hd + 1) * Dh]
        k = k_all[:, hd * Dh:(hd + 1) * Dh]
        v = qkv[:, 2 * H + hd * Dh:2 * H + (hd + 1) * Dh]

        s = jax.lax.dot_general(q, k, (((1,), (1,)), ((), ())),
                                preferred_element_type=jnp.float32) * scale
        s = jnp.where(keep, s, jnp.float32(-1e30))
        m = jnp.max(s, axis=-1, keepdims=True)
        p = jnp.exp(s - m)
        denom = jnp.maximum(jnp.sum(p, axis=-1, keepdims=True), 1e-30)  # guard empty rows
        p = p * pl.reciprocal(denom, approx=True)
        o_h = jnp.dot(p, v, preferred_element_type=jnp.float32)          # (T, Dh)

        # (attn @ Wo) == sum_h o_h @ Wo[h*Dh:(h+1)*Dh, :]  (ref row-slice, no concat)
        attn_proj = attn_proj + jnp.dot(o_h.astype(jnp.bfloat16),
                                        wo_ref[hd * Dh:(hd + 1) * Dh, :],
                                        preferred_element_type=jnp.float32)

    x = x + attn_proj                                          # residual (fused)

    # ---- pre-FFN RMSNorm fused with gated-SiLU FFN + residual ----
    var2 = jnp.mean(x * x, axis=-1, keepdims=True)
    h2 = (x * jax.lax.rsqrt(var2 + 1e-6) * fn_ref[...]).astype(jnp.bfloat16)
    g = jnp.dot(h2, wg_ref[...], preferred_element_type=jnp.float32)
    u = jnp.dot(h2, wu_ref[...], preferred_element_type=jnp.float32)
    act = (g * jax.nn.sigmoid(g)) * u                          # SiLU(gate) * up, f32
    x = x + jnp.dot(act.astype(jnp.bfloat16), wd_ref[...],
                    preferred_element_type=jnp.float32)

    o_ref[0] = x.astype(o_ref.dtype)


def pallas_decoder_layer(text_length, x, cosf, sinf, rot, layer):
    Bz, Tz, H = x.shape
    grid_spec = pltpu.PrefetchScalarGridSpec(
        num_scalar_prefetch=1,
        grid=(Bz,),
        in_specs=[
            pl.BlockSpec((1, Tz, H), lambda b, L: (b, 0, 0)),          # x
            pl.BlockSpec((Tz, H), lambda b, L: (0, 0)),                # cos table (all heads)
            pl.BlockSpec((Tz, H), lambda b, L: (0, 0)),                # sin table (all heads)
            pl.BlockSpec((H, H), lambda b, L: (0, 0)),                 # rotate-half matrix
            pl.BlockSpec((1, H), lambda b, L: (0, 0)),                 # attn norm weight
            pl.BlockSpec((H, 3 * H), lambda b, L: (0, 0)),             # fused Wqkv
            pl.BlockSpec((H, H), lambda b, L: (0, 0)),                 # Wo
            pl.BlockSpec((1, H), lambda b, L: (0, 0)),                 # ffn norm weight
            pl.BlockSpec((H, FFN), lambda b, L: (0, 0)),               # W_gate
            pl.BlockSpec((H, FFN), lambda b, L: (0, 0)),               # W_up
            pl.BlockSpec((FFN, H), lambda b, L: (0, 0)),               # W_down
        ],
        out_specs=pl.BlockSpec((1, Tz, H), lambda b, L: (b, 0, 0)),
    )
    return pl.pallas_call(
        _layer_kernel,
        out_shape=jax.ShapeDtypeStruct((Bz, Tz, H), jnp.float32),
        grid_spec=grid_spec,
        compiler_params=pltpu.CompilerParams(
            dimension_semantics=("parallel",)),
    )(text_length, x, cosf, sinf, rot,
      layer["attn_norm"], layer["wqkv"], layer["wo"],
      layer["ffn_norm"], layer["w_gate"], layer["w_up"], layer["w_down"])


# ----------------------------------------------------------------------
# Fused final-norm + vocab projection + cross-entropy / accuracy kernel
# (logits never hit HBM)
# ----------------------------------------------------------------------
def _head_ce_kernel(x_ref, nw_ref, wout_ref, tgt_ref, out_ref):
    x = x_ref[...].astype(jnp.float32)                        # (N, H)
    var = jnp.mean(x * x, axis=-1, keepdims=True)
    h = (x * jax.lax.rsqrt(var + 1e-6) * nw_ref[...]).astype(jnp.bfloat16)
    logits = jnp.dot(h, wout_ref[...],
                     preferred_element_type=jnp.float32)      # (N, V) stays in VMEM

    tgt = tgt_ref[...]                                        # (N, 1) int32
    V = logits.shape[-1]
    valid = (tgt != IGNORE_ID).astype(jnp.float32)
    m = jnp.max(logits, axis=-1, keepdims=True)
    lse = m + jnp.log(jnp.sum(jnp.exp(logits - m), axis=-1, keepdims=True))
    col = jax.lax.broadcasted_iota(jnp.int32, logits.shape, 1)
    tgt_logit = jnp.sum(jnp.where(col == tgt, logits, 0.0), axis=-1, keepdims=True)
    nll = lse - tgt_logit                                     # (N, 1)
    pred = jnp.min(jnp.where(logits == m, col, V), axis=-1, keepdims=True)  # first argmax
    correct = (pred == tgt).astype(jnp.float32) * valid
    out_ref[0] = jnp.sum(nll * valid)                         # loss numerator
    out_ref[1] = jnp.sum(valid)                               # non-ignored count
    out_ref[2] = jnp.sum(correct)                             # correct count


def pallas_head_ce(x2d, norm_w, w_out, target2d):
    return pl.pallas_call(
        _head_ce_kernel,
        out_shape=jax.ShapeDtypeStruct((3,), jnp.float32),
        in_specs=[pl.BlockSpec(memory_space=pltpu.MemorySpace.VMEM)] * 4,
        out_specs=pl.BlockSpec(memory_space=pltpu.MemorySpace.SMEM),
    )(x2d, norm_w.reshape(1, -1), w_out, target2d)


# ----------------------------------------------------------------------
# Forward pass (glue: embedding gather, RoPE tables, reshapes)
# ----------------------------------------------------------------------
def causal_lm_forward(params, text, text_length, target):
    Bz, Tz = text.shape
    H = HIDDEN

    # embedding lookup (gather is plain-JAX glue)
    x = params["embed"][text].astype(jnp.float32)             # (B, T, H)

    # RoPE tables, tiled over all heads so the kernel works on full 128-lane slabs.
    pos = jnp.arange(Tz, dtype=jnp.float32)
    inv = 1.0 / (10000.0 ** (jnp.arange(HALF, dtype=jnp.float32) / HALF))
    ang = pos[:, None] * inv[None, :]                          # (T, HALF)
    cos = jnp.cos(ang)
    sin = jnp.sin(ang)
    cos_head = jnp.concatenate([cos, cos], axis=-1)            # (T, Dh)
    sin_head = jnp.concatenate([sin, sin], axis=-1)            # (T, Dh)
    cosf = jnp.tile(cos_head, (1, N_HEAD))                     # (T, H)
    sinf = jnp.tile(sin_head, (1, N_HEAD))                     # (T, H)
    idx = jnp.arange(HEAD_DIM)
    rot_head = (-(idx[:, None] == (idx[None, :] + HALF)).astype(jnp.float32)
                + (idx[:, None] == (idx[None, :] - HALF)).astype(jnp.float32))
    rot = jnp.kron(jnp.eye(N_HEAD, dtype=jnp.float32), rot_head)  # (H, H) block-diag: x@rot = [-x2, x1] per head

    for layer in params["layers"]:
        x = pallas_decoder_layer(text_length, x, cosf, sinf, rot, layer)

    x2 = x.reshape(Bz * Tz, H)
    tgt2d = target.reshape(Bz * Tz, 1).astype(jnp.int32)
    stats = pallas_head_ce(x2, params["final_norm"], params["w_out"], tgt2d)

    denom = jnp.maximum(stats[1], 1.0)                         # guard: all-ignored batch
    loss = stats[0] / denom
    ppl = jnp.exp(loss)
    acc = stats[2] / denom                                     # th_accuracy
    return {"loss": loss, "ppl": ppl, "th_accuracy": acc}


# ----------------------------------------------------------------------
if __name__ == "__main__":
    key = jax.random.PRNGKey(0)
    keys = iter(jax.random.split(key, 64))

    def nrm(shape, scale=0.02, dtype=jnp.float32):
        w = jax.random.normal(next(keys), shape, dtype=jnp.float32) * scale
        return w.astype(dtype)

    layers = []
    for _ in range(N_LAYERS):
        layers.append({
            "attn_norm": jnp.ones((1, HIDDEN), jnp.float32),
            "ffn_norm": jnp.ones((1, HIDDEN), jnp.float32),
            # fused wq|wk|wv, bf16 MXU operands
            "wqkv": nrm((HIDDEN, 3 * HIDDEN), dtype=jnp.bfloat16),
            "wo": nrm((N_HEAD * HEAD_DIM, HIDDEN), dtype=jnp.bfloat16),
            "w_gate": nrm((HIDDEN, FFN), dtype=jnp.bfloat16),
            "w_up": nrm((HIDDEN, FFN), dtype=jnp.bfloat16),
            "w_down": nrm((FFN, HIDDEN), dtype=jnp.bfloat16),
        })
    params = {
        "embed": nrm((VOCAB, HIDDEN), 1.0),                    # nn.Embedding(vocab, hidden)
        "w_out": nrm((HIDDEN, VOCAB), dtype=jnp.bfloat16),     # nn.Linear(hidden, vocab) weight^T
        "final_norm": jnp.ones((HIDDEN,), jnp.float32),
        "layers": layers,
    }
    # TODO(synk): tie_word_embedding (sharing embed/out weights) not exercised here.

    # batch = {'feats': text, 'feats_lengths': text_length, 'target': target}
    text = jax.random.randint(next(keys), (B, T), 0, VOCAB, dtype=jnp.int32)
    text_length = jnp.array([T, 10], dtype=jnp.int32)
    shifted = jnp.concatenate(
        [text[:, 1:], jnp.full((B, 1), IGNORE_ID, jnp.int32)], axis=1)
    tpos = jnp.arange(T)[None, :]
    target = jnp.where(tpos < (text_length[:, None] - 1), shifted, IGNORE_ID)

    # TODO(synk): generate() (autoregressive sampling with kv-cache) is an inference-only
    # python loop and is not implemented as a kernel.
    fwd = jax.jit(causal_lm_forward)
    out = fwd(params, text, text_length, target)
    out = jax.tree_util.tree_map(jax.block_until_ready, out)
    assert bool(jnp.isfinite(out["loss"])), "loss is not finite"
    assert 0.0 <= float(out["th_accuracy"]) <= 1.0
    print("KERNEL_OK")
</pallas_src>

<mosaic_0001>
module attributes {stable_mosaic.version = 11 : i64} {
  func.func @_layer_kernel(%arg0: i32, %arg1: memref<2xi32, #tpu.memory_space<smem>>, %arg2: memref<1x16x128xf32, #tpu.memory_space<vmem>>, %arg3: memref<16x128xf32, #tpu.memory_space<vmem>>, %arg4: memref<16x128xf32, #tpu.memory_space<vmem>>, %arg5: memref<128x128xf32, #tpu.memory_space<vmem>>, %arg6: memref<1x128xf32, #tpu.memory_space<vmem>>, %arg7: memref<128x384xbf16, #tpu.memory_space<vmem>>, %arg8: memref<128x128xbf16, #tpu.memory_space<vmem>>, %arg9: memref<1x128xf32, #tpu.memory_space<vmem>>, %arg10: memref<128x256xbf16, #tpu.memory_space<vmem>>, %arg11: memref<128x256xbf16, #tpu.memory_space<vmem>>, %arg12: memref<256x128xbf16, #tpu.memory_space<vmem>>, %arg13: memref<1x16x128xf32, #tpu.memory_space<vmem>>) attributes {dimension_semantics = [#tpu.dimension_semantics<parallel>], iteration_bounds = array<i64: 2>, scalar_prefetch = 1 : i64, scratch_operands = 0 : i64, tpu.core_type = #tpu.core_type<tc>, window_params = [{transform_indices = @transform_0, window_bounds = array<i64: 1, 16, 128>}, {pipeline_mode = #tpu.pipeline_mode<synchronous>, transform_indices = @transform_1, window_bounds = array<i64: 16, 128>}, {pipeline_mode = #tpu.pipeline_mode<synchronous>, transform_indices = @transform_2, window_bounds = array<i64: 16, 128>}, {pipeline_mode = #tpu.pipeline_mode<synchronous>, transform_indices = @transform_3, window_bounds = array<i64: 128, 128>}, {pipeline_mode = #tpu.pipeline_mode<synchronous>, transform_indices = @transform_4, window_bounds = array<i64: 1, 128>}, {pipeline_mode = #tpu.pipeline_mode<synchronous>, transform_indices = @transform_5, window_bounds = array<i64: 128, 384>}, {pipeline_mode = #tpu.pipeline_mode<synchronous>, transform_indices = @transform_6, window_bounds = array<i64: 128, 128>}, {pipeline_mode = #tpu.pipeline_mode<synchronous>, transform_indices = @transform_7, window_bounds = array<i64: 1, 128>}, {pipeline_mode = #tpu.pipeline_mode<synchronous>, transform_indices = @transform_8, window_bounds = array<i64: 128, 256>}, {pipeline_mode = #tpu.pipeline_mode<synchronous>, transform_indices = @transform_9, window_bounds = array<i64: 128, 256>}, {pipeline_mode = #tpu.pipeline_mode<synchronous>, transform_indices = @transform_10, window_bounds = array<i64: 256, 128>}, {transform_indices = @transform_11, window_bounds = array<i64: 1, 16, 128>}]} {
    %c0 = arith.constant 0 : index
    %c0_0 = arith.constant 0 : index
    %c0_1 = arith.constant 0 : index
    %0 = vector.load %arg2[%c0, %c0_0, %c0_1] : memref<1x16x128xf32, #tpu.memory_space<vmem>>, vector<1x16x128xf32>
    %1 = vector.shape_cast %0 : vector<1x16x128xf32> to vector<16x128xf32>
    %2 = arith.mulf %1, %1 : vector<16x128xf32>
    %cst = arith.constant dense<0.000000e+00> : vector<16xf32>
    %3 = vector.multi_reduction <add>, %2, %cst [1] : vector<16x128xf32> to vector<16xf32>
    %4 = vector.shape_cast %3 : vector<16xf32> to vector<16x1xf32>
    %cst_2 = arith.constant 1.280000e+02 : f32
    %5 = vector.broadcast %cst_2 : f32 to vector<16x1xf32>
    %6 = arith.divf %4, %5 : vector<16x1xf32>
    %cst_3 = arith.constant 9.99999997E-7 : f32
    %7 = vector.broadcast %cst_3 : f32 to vector<16x1xf32>
    %8 = arith.addf %6, %7 : vector<16x1xf32>
    %9 = math.rsqrt %8 : vector<16x1xf32>
    %10 = vector.broadcast %9 : vector<16x1xf32> to vector<16x128xf32>
    %11 = arith.mulf %1, %10 : vector<16x128xf32>
    %c0_4 = arith.constant 0 : index
    %c0_5 = arith.constant 0 : index
    %12 = vector.load %arg6[%c0_4, %c0_5] : memref<1x128xf32, #tpu.memory_space<vmem>>, vector<1x128xf32>
    %13 = vector.broadcast %12 : vector<1x128xf32> to vector<16x128xf32>
    %14 = arith.mulf %11, %13 : vector<16x128xf32>
    %15 = arith.truncf %14 : vector<16x128xf32> to vector<16x128xbf16>
    %c0_6 = arith.constant 0 : index
    %c0_7 = arith.constant 0 : index
    %16 = vector.load %arg7[%c0_6, %c0_7] : memref<128x384xbf16, #tpu.memory_space<vmem>>, vector<128x384xbf16>
    %cst_8 = arith.constant dense<0.000000e+00> : vector<16x384xf32>
    %17 = tpu.matmul %15, %16, %cst_8 {dimension_numbers = #tpu.dot_dimension_numbers<[1], [0], [0], [1], [0, 0, 1, 1], [], []>} : vector<16x128xbf16>, vector<128x384xbf16>, vector<16x384xf32> -> vector<16x384xf32>
    %18 = arith.index_cast %arg0 : i32 to index
    %19 = memref.load %arg1[%18] : memref<2xi32, #tpu.memory_space<smem>>
    %20 = tpu.iota {dimensions = array<i32: 0>} : vector<16x16xi32>
    %21 = tpu.iota {dimensions = array<i32: 1>} : vector<16x16xi32>
    %22 = arith.cmpi sle, %21, %20 : vector<16x16xi32>
    %23 = vector.broadcast %19 : i32 to vector<16x16xi32>
    %24 = arith.cmpi slt, %21, %23 : vector<16x16xi32>
    %25 = arith.andi %22, %24 : vector<16x16xi1>
    %c0_9 = arith.constant 0 : index
    %c0_10 = arith.constant 0 : index
    %26 = vector.load %arg3[%c0_9, %c0_10] : memref<16x128xf32, #tpu.memory_space<vmem>>, vector<16x128xf32>
    %c0_11 = arith.constant 0 : index
    %c0_12 = arith.constant 0 : index
    %27 = vector.load %arg4[%c0_11, %c0_12] : memref<16x128xf32, #tpu.memory_space<vmem>>, vector<16x128xf32>
    %c0_13 = arith.constant 0 : index
    %c0_14 = arith.constant 0 : index
    %28 = vector.load %arg5[%c0_13, %c0_14] : memref<128x128xf32, #tpu.memory_space<vmem>>, vector<128x128xf32>
    %29 = vector.extract_strided_slice %17 {offsets = [0, 0], sizes = [16, 128], strides = [1, 1]} : vector<16x384xf32> to vector<16x128xf32>
    %30 = vector.extract_strided_slice %17 {offsets = [0, 128], sizes = [16, 128], strides = [1, 1]} : vector<16x384xf32> to vector<16x128xf32>
    %31 = arith.mulf %29, %26 : vector<16x128xf32>
    %cst_15 = arith.constant dense<0.000000e+00> : vector<16x128xf32>
    %32 = tpu.matmul %29, %28, %cst_15 {dimension_numbers = #tpu.dot_dimension_numbers<[1], [0], [0], [1], [0, 0, 1, 1], [], []>} : vector<16x128xf32>, vector<128x128xf32>, vector<16x128xf32> -> vector<16x128xf32>
    %33 = arith.mulf %32, %27 : vector<16x128xf32>
    %34 = arith.addf %31, %33 : vector<16x128xf32>
    %35 = arith.mulf %30, %26 : vector<16x128xf32>
    %cst_16 = arith.constant dense<0.000000e+00> : vector<16x128xf32>
    %36 = tpu.matmul %30, %28, %cst_16 {dimension_numbers = #tpu.dot_dimension_numbers<[1], [0], [0], [1], [0, 0, 1, 1], [], []>} : vector<16x128xf32>, vector<128x128xf32>, vector<16x128xf32> -> vector<16x128xf32>
    %37 = arith.mulf %36, %27 : vector<16x128xf32>
    %38 = arith.addf %35, %37 : vector<16x128xf32>
    %cst_17 = arith.constant 0.000000e+00 : f32
    %39 = vector.broadcast %cst_17 : f32 to vector<16x128xf32>
    %40 = vector.extract_strided_slice %34 {offsets = [0, 0], sizes = [16, 32], strides = [1, 1]} : vector<16x128xf32> to vector<16x32xf32>
    %41 = vector.extract_strided_slice %38 {offsets = [0, 0], sizes = [16, 32], strides = [1, 1]} : vector<16x128xf32> to vector<16x32xf32>
    %42 = vector.extract_strided_slice %17 {offsets = [0, 256], sizes = [16, 32], strides = [1, 1]} : vector<16x384xf32> to vector<16x32xf32>
    %cst_18 = arith.constant dense<0.000000e+00> : vector<16x16xf32>
    %43 = tpu.matmul %40, %41, %cst_18 {dimension_numbers = #tpu.dot_dimension_numbers<[1], [1], [0], [0], [0, 0, 1, 0], [], []>} : vector<16x32xf32>, vector<16x32xf32>, vector<16x16xf32> -> vector<16x16xf32>
    %cst_19 = arith.constant 0.176776692 : f32
    %44 = vector.broadcast %cst_19 : f32 to vector<16x16xf32>
    %45 = arith.mulf %43, %44 : vector<16x16xf32>
    %cst_20 = arith.constant -1.000000e+30 : f32
    %46 = vector.broadcast %cst_20 : f32 to vector<16x16xf32>
    %47 = arith.select %25, %45, %46 : vector<16x16xi1>, vector<16x16xf32>
    %cst_21 = arith.constant dense<0xFF800000> : vector<16xf32>
    %48 = vector.multi_reduction <maximumf>, %47, %cst_21 [1] : vector<16x16xf32> to vector<16xf32>
    %49 = vector.shape_cast %48 : vector<16xf32> to vector<16x1xf32>
    %50 = vector.broadcast %49 : vector<16x1xf32> to vector<16x16xf32>
    %51 = arith.subf %47, %50 : vector<16x16xf32>
    %52 = math.exp %51 : vector<16x16xf32>
    %cst_22 = arith.constant dense<0.000000e+00> : vector<16xf32>
    %53 = vector.multi_reduction <add>, %52, %cst_22 [1] : vector<16x16xf32> to vector<16xf32>
    %54 = vector.shape_cast %53 : vector<16xf32> to vector<16x1xf32>
    %cst_23 = arith.constant 1.000000e-30 : f32
    %55 = vector.broadcast %cst_23 : f32 to vector<16x1xf32>
    %56 = arith.maximumf %54, %55 : vector<16x1xf32>
    %57 = tpu.reciprocal %56 {approx = true} : vector<16x1xf32> -> vector<16x1xf32>
    %58 = vector.broadcast %57 : vector<16x1xf32> to vector<16x16xf32>
    %59 = arith.mulf %52, %58 : vector<16x16xf32>
    %cst_24 = arith.constant dense<0.000000e+00> : vector<16x32xf32>
    %60 = tpu.matmul %59, %42, %cst_24 {dimension_numbers = #tpu.dot_dimension_numbers<[1], [0], [0], [1], [0, 0, 1, 1], [], []>} : vector<16x16xf32>, vector<16x32xf32>, vector<16x32xf32> -> vector<16x32xf32>
    %61 = arith.truncf %60 : vector<16x32xf32> to vector<16x32xbf16>
    %c0_25 = arith.constant 0 : index
    %c0_26 = arith.constant 0 : index
    %62 = vector.load %arg8[%c0_25, %c0_26] : memref<128x128xbf16, #tpu.memory_space<vmem>>, vector<32x128xbf16>
    %cst_27 = arith.constant dense<0.000000e+00> : vector<16x128xf32>
    %63 = tpu.matmul %61, %62, %cst_27 {dimension_numbers = #tpu.dot_dimension_numbers<[1], [0], [0], [1], [0, 0, 1, 1], [], []>} : vector<16x32xbf16>, vector<32x128xbf16>, vector<16x128xf32> -> vector<16x128xf32>
    %64 = arith.addf %39, %63 : vector<16x128xf32>
    %65 = vector.extract_strided_slice %34 {offsets = [0, 32], sizes = [16, 32], strides = [1, 1]} : vector<16x128xf32> to vector<16x32xf32>
    %66 = vector.extract_strided_slice %38 {offsets = [0, 32], sizes = [16, 32], strides = [1, 1]} : vector<16x128xf32> to vector<16x32xf32>
    %67 = vector.extract_strided_slice %17 {offsets = [0, 288], sizes = [16, 32], strides = [1, 1]} : vector<16x384xf32> to vector<16x32xf32>
    %cst_28 = arith.constant dense<0.000000e+00> : vector<16x16xf32>
    %68 = tpu.matmul %65, %66, %cst_28 {dimension_numbers = #tpu.dot_dimension_numbers<[1], [1], [0], [0], [0, 0, 1, 0], [], []>} : vector<16x32xf32>, vector<16x32xf32>, vector<16x16xf32> -> vector<16x16xf32>
    %cst_29 = arith.constant 0.176776692 : f32
    %69 = vector.broadcast %cst_29 : f32 to vector<16x16xf32>
    %70 = arith.mulf %68, %69 : vector<16x16xf32>
    %cst_30 = arith.constant -1.000000e+30 : f32
    %71 = vector.broadcast %cst_30 : f32 to vector<16x16xf32>
    %72 = arith.select %25, %70, %71 : vector<16x16xi1>, vector<16x16xf32>
    %cst_31 = arith.constant dense<0xFF800000> : vector<16xf32>
    %73 = vector.multi_reduction <maximumf>, %72, %cst_31 [1] : vector<16x16xf32> to vector<16xf32>
    %74 = vector.shape_cast %73 : vector<16xf32> to vector<16x1xf32>
    %75 = vector.broadcast %74 : vector<16x1xf32> to vector<16x16xf32>
    %76 = arith.subf %72, %75 : vector<16x16xf32>
    %77 = math.exp %76 : vector<16x16xf32>
    %cst_32 = arith.constant dense<0.000000e+00> : vector<16xf32>
    %78 = vector.multi_reduction <add>, %77, %cst_32 [1] : vector<16x16xf32> to vector<16xf32>
    %79 = vector.shape_cast %78 : vector<16xf32> to vector<16x1xf32>
    %cst_33 = arith.constant 1.000000e-30 : f32
    %80 = vector.broadcast %cst_33 : f32 to vector<16x1xf32>
    %81 = arith.maximumf %79, %80 : vector<16x1xf32>
    %82 = tpu.reciprocal %81 {approx = true} : vector<16x1xf32> -> vector<16x1xf32>
    %83 = vector.broadcast %82 : vector<16x1xf32> to vector<16x16xf32>
    %84 = arith.mulf %77, %83 : vector<16x16xf32>
    %cst_34 = arith.constant dense<0.000000e+00> : vector<16x32xf32>
    %85 = tpu.matmul %84, %67, %cst_34 {dimension_numbers = #tpu.dot_dimension_numbers<[1], [0], [0], [1], [0, 0, 1, 1], [], []>} : vector<16x16xf32>, vector<16x32xf32>, vector<16x32xf32> -> vector<16x32xf32>
    %86 = arith.truncf %85 : vector<16x32xf32> to vector<16x32xbf16>
    %c32 = arith.constant 32 : index
    %c0_35 = arith.constant 0 : index
    %87 = vector.load %arg8[%c32, %c0_35] : memref<128x128xbf16, #tpu.memory_space<vmem>>, vector<32x128xbf16>
    %cst_36 = arith.constant dense<0.000000e+00> : vector<16x128xf32>
    %88 = tpu.matmul %86, %87, %cst_36 {dimension_numbers = #tpu.dot_dimension_numbers<[1], [0], [0], [1], [0, 0, 1, 1], [], []>} : vector<16x32xbf16>, vector<32x128xbf16>, vector<16x128xf32> -> vector<16x128xf32>
    %89 = arith.addf %64, %88 : vector<16x128xf32>
    %90 = vector.extract_strided_slice %34 {offsets = [0, 64], sizes = [16, 32], strides = [1, 1]} : vector<16x128xf32> to vector<16x32xf32>
    %91 = vector.extract_strided_slice %38 {offsets = [0, 64], sizes = [16, 32], strides = [1, 1]} : vector<16x128xf32> to vector<16x32xf32>
    %92 = vector.extract_strided_slice %17 {offsets = [0, 320], sizes = [16, 32], strides = [1, 1]} : vector<16x384xf32> to vector<16x32xf32>
    %cst_37 = arith.constant dense<0.000000e+00> : vector<16x16xf32>
    %93 = tpu.matmul %90, %91, %cst_37 {dimension_numbers = #tpu.dot_dimension_numbers<[1], [1], [0], [0], [0, 0, 1, 0], [], []>} : vector<16x32xf32>, vector<16x32xf32>, vector<16x16xf32> -> vector<16x16xf32>
    %cst_38 = arith.constant 0.176776692 : f32
    %94 = vector.broadcast %cst_38 : f32 to vector<16x16xf32>
    %95 = arith.mulf %93, %94 : vector<16x16xf32>
    %cst_39 = arith.constant -1.000000e+30 : f32
    %96 = vector.broadcast %cst_39 : f32 to vector<16x16xf32>
    %97 = arith.select %25, %95, %96 : vector<16x16xi1>, vector<16x16xf32>
    %cst_40 = arith.constant dense<0xFF800000> : vector<16xf32>
    %98 = vector.multi_reduction <maximumf>, %97, %cst_40 [1] : vector<16x16xf32> to vector<16xf32>
    %99 = vector.shape_cast %98 : vector<16xf32> to vector<16x1xf32>
    %100 = vector.broadcast %99 : vector<16x1xf32> to vector<16x16xf32>
    %101 = arith.subf %97, %100 : vector<16x16xf32>
    %102 = math.exp %101 : vector<16x16xf32>
    %cst_41 = arith.constant dense<0.000000e+00> : vector<16xf32>
    %103 = vector.multi_reduction <add>, %102, %cst_41 [1] : vector<16x16xf32> to vector<16xf32>
    %104 = vector.shape_cast %103 : vector<16xf32> to vector<16x1xf32>
    %cst_42 = arith.constant 1.000000e-30 : f32
    %105 = vector.broadcast %cst_42 : f32 to vector<16x1xf32>
    %106 = arith.maximumf %104, %105 : vector<16x1xf32>
    %107 = tpu.reciprocal %106 {approx = true} : vector<16x1xf32> -> vector<16x1xf32>
    %108 = vector.broadcast %107 : vector<16x1xf32> to vector<16x16xf32>
    %109 = arith.mulf %102, %108 : vector<16x16xf32>
    %cst_43 = arith.constant dense<0.000000e+00> : vector<16x32xf32>
    %110 = tpu.matmul %109, %92, %cst_43 {dimension_numbers = #tpu.dot_dimension_numbers<[1], [0], [0], [1], [0, 0, 1, 1], [], []>} : vector<16x16xf32>, vector<16x32xf32>, vector<16x32xf32> -> vector<16x32xf32>
    %111 = arith.truncf %110 : vector<16x32xf32> to vector<16x32xbf16>
    %c64 = arith.constant 64 : index
    %c0_44 = arith.constant 0 : index
    %112 = vector.load %arg8[%c64, %c0_44] : memref<128x128xbf16, #tpu.memory_space<vmem>>, vector<32x128xbf16>
    %cst_45 = arith.constant dense<0.000000e+00> : vector<16x128xf32>
    %113 = tpu.matmul %111, %112, %cst_45 {dimension_numbers = #tpu.dot_dimension_numbers<[1], [0], [0], [1], [0, 0, 1, 1], [], []>} : vector<16x32xbf16>, vector<32x128xbf16>, vector<16x128xf32> -> vector<16x128xf32>
    %114 = arith.addf %89, %113 : vector<16x128xf32>
    %115 = vector.extract_strided_slice %34 {offsets = [0, 96], sizes = [16, 32], strides = [1, 1]} : vector<16x128xf32> to vector<16x32xf32>
    %116 = vector.extract_strided_slice %38 {offsets = [0, 96], sizes = [16, 32], strides = [1, 1]} : vector<16x128xf32> to vector<16x32xf32>
    %117 = vector.extract_strided_slice %17 {offsets = [0, 352], sizes = [16, 32], strides = [1, 1]} : vector<16x384xf32> to vector<16x32xf32>
    %cst_46 = arith.constant dense<0.000000e+00> : vector<16x16xf32>
    %118 = tpu.matmul %115, %116, %cst_46 {dimension_numbers = #tpu.dot_dimension_numbers<[1], [1], [0], [0], [0, 0, 1, 0], [], []>} : vector<16x32xf32>, vector<16x32xf32>, vector<16x16xf32> -> vector<16x16xf32>
    %cst_47 = arith.constant 0.176776692 : f32
    %119 = vector.broadcast %cst_47 : f32 to vector<16x16xf32>
    %120 = arith.mulf %118, %119 : vector<16x16xf32>
    %cst_48 = arith.constant -1.000000e+30 : f32
    %121 = vector.broadcast %cst_48 : f32 to vector<16x16xf32>
    %122 = arith.select %25, %120, %121 : vector<16x16xi1>, vector<16x16xf32>
    %cst_49 = arith.constant dense<0xFF800000> : vector<16xf32>
    %123 = vector.multi_reduction <maximumf>, %122, %cst_49 [1] : vector<16x16xf32> to vector<16xf32>
    %124 = vector.shape_cast %123 : vector<16xf32> to vector<16x1xf32>
    %125 = vector.broadcast %124 : vector<16x1xf32> to vector<16x16xf32>
    %126 = arith.subf %122, %125 : vector<16x16xf32>
    %127 = math.exp %126 : vector<16x16xf32>
    %cst_50 = arith.constant dense<0.000000e+00> : vector<16xf32>
    %128 = vector.multi_reduction <add>, %127, %cst_50 [1] : vector<16x16xf32> to vector<16xf32>
    %129 = vector.shape_cast %128 : vector<16xf32> to vector<16x1xf32>
    %cst_51 = arith.constant 1.000000e-30 : f32
    %130 = vector.broadcast %cst_51 : f32 to vector<16x1xf32>
    %131 = arith.maximumf %129, %130 : vector<16x1xf32>
    %132 = tpu.reciprocal %131 {approx = true} : vector<16x1xf32> -> vector<16x1xf32>
    %133 = vector.broadcast %132 : vector<16x1xf32> to vector<16x16xf32>
    %134 = arith.mulf %127, %133 : vector<16x16xf32>
    %cst_52 = arith.constant dense<0.000000e+00> : vector<16x32xf32>
    %135 = tpu.matmul %134, %117, %cst_52 {dimension_numbers = #tpu.dot_dimension_numbers<[1], [0], [0], [1], [0, 0, 1, 1], [], []>} : vector<16x16xf32>, vector<16x32xf32>, vector<16x32xf32> -> vector<16x32xf32>
    %136 = arith.truncf %135 : vector<16x32xf32> to vector<16x32xbf16>
    %c96 = arith.constant 96 : index
    %c0_53 = arith.constant 0 : index
    %137 = vector.load %arg8[%c96, %c0_53] : memref<128x128xbf16, #tpu.memory_space<vmem>>, vector<32x128xbf16>
    %cst_54 = arith.constant dense<0.000000e+00> : vector<16x128xf32>
    %138 = tpu.matmul %136, %137, %cst_54 {dimension_numbers = #tpu.dot_dimension_numbers<[1], [0], [0], [1], [0, 0, 1, 1], [], []>} : vector<16x32xbf16>, vector<32x128xbf16>, vector<16x128xf32> -> vector<16x128xf32>
    %139 = arith.addf %114, %138 : vector<16x128xf32>
    %140 = arith.addf %1, %139 : vector<16x128xf32>
    %141 = arith.mulf %140, %140 : vector<16x128xf32>
    %cst_55 = arith.constant dense<0.000000e+00> : vector<16xf32>
    %142 = vector.multi_reduction <add>, %141, %cst_55 [1] : vector<16x128xf32> to vector<16xf32>
    %143 = vector.shape_cast %142 : vector<16xf32> to vector<16x1xf32>
    %cst_56 = arith.constant 1.280000e+02 : f32
    %144 = vector.broadcast %cst_56 : f32 to vector<16x1xf32>
    %145 = arith.divf %143, %144 : vector<16x1xf32>
    %cst_57 = arith.constant 9.99999997E-7 : f32
    %146 = vector.broadcast %cst_57 : f32 to vector<16x1xf32>
    %147 = arith.addf %145, %146 : vector<16x1xf32>
    %148 = math.rsqrt %147 : vector<16x1xf32>
    %149 = vector.broadcast %148 : vector<16x1xf32> to vector<16x128xf32>
    %150 = arith.mulf %140, %149 : vector<16x128xf32>
    %c0_58 = arith.constant 0 : index
    %c0_59 = arith.constant 0 : index
    %151 = vector.load %arg9[%c0_58, %c0_59] : memref<1x128xf32, #tpu.memory_space<vmem>>, vector<1x128xf32>
    %152 = vector.broadcast %151 : vector<1x128xf32> to vector<16x128xf32>
    %153 = arith.mulf %150, %152 : vector<16x128xf32>
    %154 = arith.truncf %153 : vector<16x128xf32> to vector<16x128xbf16>
    %c0_60 = arith.constant 0 : index
    %c0_61 = arith.constant 0 : index
    %155 = vector.load %arg10[%c0_60, %c0_61] : memref<128x256xbf16, #tpu.memory_space<vmem>>, vector<128x256xbf16>
    %cst_62 = arith.constant dense<0.000000e+00> : vector<16x256xf32>
    %156 = tpu.matmul %154, %155, %cst_62 {dimension_numbers = #tpu.dot_dimension_numbers<[1], [0], [0], [1], [0, 0, 1, 1], [], []>} : vector<16x128xbf16>, vector<128x256xbf16>, vector<16x256xf32> -> vector<16x256xf32>
    %c0_63 = arith.constant 0 : index
    %c0_64 = arith.constant 0 : index
    %157 = vector.load %arg11[%c0_63, %c0_64] : memref<128x256xbf16, #tpu.memory_space<vmem>>, vector<128x256xbf16>
    %cst_65 = arith.constant dense<0.000000e+00> : vector<16x256xf32>
    %158 = tpu.matmul %154, %157, %cst_65 {dimension_numbers = #tpu.dot_dimension_numbers<[1], [0], [0], [1], [0, 0, 1, 1], [], []>} : vector<16x128xbf16>, vector<128x256xbf16>, vector<16x256xf32> -> vector<16x256xf32>
    %159 = arith.negf %156 : vector<16x256xf32>
    %160 = math.exp %159 : vector<16x256xf32>
    %cst_66 = arith.constant 1.000000e+00 : f32
    %161 = vector.broadcast %cst_66 : f32 to vector<16x256xf32>
    %162 = arith.addf %161, %160 : vector<16x256xf32>
    %163 = arith.divf %161, %162 : vector<16x256xf32>
    %164 = arith.mulf %156, %163 : vector<16x256xf32>
    %165 = arith.mulf %164, %158 : vector<16x256xf32>
    %166 = arith.truncf %165 : vector<16x256xf32> to vector<16x256xbf16>
    %c0_67 = arith.constant 0 : index
    %c0_68 = arith.constant 0 : index
    %167 = vector.load %arg12[%c0_67, %c0_68] : memref<256x128xbf16, #tpu.memory_space<vmem>>, vector<256x128xbf16>
    %cst_69 = arith.constant dense<0.000000e+00> : vector<16x128xf32>
    %168 = tpu.matmul %166, %167, %cst_69 {dimension_numbers = #tpu.dot_dimension_numbers<[1], [0], [0], [1], [0, 0, 1, 1], [], []>} : vector<16x256xbf16>, vector<256x128xbf16>, vector<16x128xf32> -> vector<16x128xf32>
    %169 = arith.addf %140, %168 : vector<16x128xf32>
    %c0_70 = arith.constant 0 : index
    %c0_71 = arith.constant 0 : index
    %c0_72 = arith.constant 0 : index
    %170 = vector.load %arg13[%c0_70, %c0_71, %c0_72] : memref<1x16x128xf32, #tpu.memory_space<vmem>>, vector<1x16x128xf32>
    %171 = vector.shape_cast %170 : vector<1x16x128xf32> to vector<16x128xf32>
    %172 = vector.shape_cast %169 : vector<16x128xf32> to vector<1x16x128xf32>
    tpu.vector_store %arg13[%c0_70, %c0_71, %c0_72], %172 {strides = array<i32>} : memref<1x16x128xf32, #tpu.memory_space<vmem>>, vector<1x16x128xf32>,
    return
  }
  func.func @transform_0(%arg0: i32, %arg1: memref<2xi32, #tpu.memory_space<smem>>) -> (i32, i32, i32) {
    %c0_i32 = arith.constant 0 : i32
    %c0_i32_0 = arith.constant 0 : i32
    %c0_i32_1 = arith.constant 0 : i32
    return %arg0, %c0_i32, %c0_i32_0 : i32, i32, i32
  }
  func.func @transform_1(%arg0: i32, %arg1: memref<2xi32, #tpu.memory_space<smem>>) -> (i32, i32) {
    %c0_i32 = arith.constant 0 : i32
    %c0_i32_0 = arith.constant 0 : i32
    %c0_i32_1 = arith.constant 0 : i32
    return %c0_i32, %c0_i32_0 : i32, i32
  }
  func.func @transform_2(%arg0: i32, %arg1: memref<2xi32, #tpu.memory_space<smem>>) -> (i32, i32) {
    %c0_i32 = arith.constant 0 : i32
    %c0_i32_0 = arith.constant 0 : i32
    %c0_i32_1 = arith.constant 0 : i32
    return %c0_i32, %c0_i32_0 : i32, i32
  }
  func.func @transform_3(%arg0: i32, %arg1: memref<2xi32, #tpu.memory_space<smem>>) -> (i32, i32) {
    %c0_i32 = arith.constant 0 : i32
    %c0_i32_0 = arith.constant 0 : i32
    %c0_i32_1 = arith.constant 0 : i32
    return %c0_i32, %c0_i32_0 : i32, i32
  }
  func.func @transform_4(%arg0: i32, %arg1: memref<2xi32, #tpu.memory_space<smem>>) -> (i32, i32) {
    %c0_i32 = arith.constant 0 : i32
    %c0_i32_0 = arith.constant 0 : i32
    %c0_i32_1 = arith.constant 0 : i32
    return %c0_i32, %c0_i32_0 : i32, i32
  }
  func.func @transform_5(%arg0: i32, %arg1: memref<2xi32, #tpu.memory_space<smem>>) -> (i32, i32) {
    %c0_i32 = arith.constant 0 : i32
    %c0_i32_0 = arith.constant 0 : i32
    %c0_i32_1 = arith.constant 0 : i32
    return %c0_i32, %c0_i32_0 : i32, i32
  }
  func.func @transform_6(%arg0: i32, %arg1: memref<2xi32, #tpu.memory_space<smem>>) -> (i32, i32) {
    %c0_i32 = arith.constant 0 : i32
    %c0_i32_0 = arith.constant 0 : i32
    %c0_i32_1 = arith.constant 0 : i32
    return %c0_i32, %c0_i32_0 : i32, i32
  }
  func.func @transform_7(%arg0: i32, %arg1: memref<2xi32, #tpu.memory_space<smem>>) -> (i32, i32) {
    %c0_i32 = arith.constant 0 : i32
    %c0_i32_0 = arith.constant 0 : i32
    %c0_i32_1 = arith.constant 0 : i32
    return %c0_i32, %c0_i32_0 : i32, i32
  }
  func.func @transform_8(%arg0: i32, %arg1: memref<2xi32, #tpu.memory_space<smem>>) -> (i32, i32) {
    %c0_i32 = arith.constant 0 : i32
    %c0_i32_0 = arith.constant 0 : i32
    %c0_i32_1 = arith.constant 0 : i32
    return %c0_i32, %c0_i32_0 : i32, i32
  }
  func.func @transform_9(%arg0: i32, %arg1: memref<2xi32, #tpu.memory_space<smem>>) -> (i32, i32) {
    %c0_i32 = arith.constant 0 : i32
    %c0_i32_0 = arith.constant 0 : i32
    %c0_i32_1 = arith.constant 0 : i32
    return %c0_i32, %c0_i32_0 : i32, i32
  }
  func.func @transform_10(%arg0: i32, %arg1: memref<2xi32, #tpu.memory_space<smem>>) -> (i32, i32) {
    %c0_i32 = arith.constant 0 : i32
    %c0_i32_0 = arith.constant 0 : i32
    %c0_i32_1 = arith.constant 0 : i32
    return %c0_i32, %c0_i32_0 : i32, i32
  }
  func.func @transform_11(%arg0: i32, %arg1: memref<2xi32, #tpu.memory_space<smem>>) -> (i32, i32, i32) {
    %c0_i32 = arith.constant 0 : i32
    %c0_i32_0 = arith.constant 0 : i32
    %c0_i32_1 = arith.constant 0 : i32
    return %arg0, %c0_i32, %c0_i32_0 : i32, i32, i32
  }
}

module attributes {stable_mosaic.version = 11 : i64} {
  func.func @_head_ce_kernel(%arg0: memref<32x128xf32, #tpu.memory_space<vmem>>, %arg1: memref<1x128xf32, #tpu.memory_space<vmem>>, %arg2: memref<128x256xbf16, #tpu.memory_space<vmem>>, %arg3: memref<32x1xi32, #tpu.memory_space<vmem>>, %arg4: memref<3xf32, #tpu.memory_space<smem>>) attributes {dimension_semantics = [], scalar_prefetch = 0 : i64, scratch_operands = 0 : i64, tpu.core_type = #tpu.core_type<tc>} {
    %c0 = arith.constant 0 : index
    %c0_0 = arith.constant 0 : index
    %0 = vector.load %arg0[%c0, %c0_0] : memref<32x128xf32, #tpu.memory_space<vmem>>, vector<32x128xf32>
    %1 = arith.mulf %0, %0 : vector<32x128xf32>
    %cst = arith.constant dense<0.000000e+00> : vector<32xf32>
    %2 = vector.multi_reduction <add>, %1, %cst [1] : vector<32x128xf32> to vector<32xf32>
    %3 = vector.shape_cast %2 : vector<32xf32> to vector<32x1xf32>
    %cst_1 = arith.constant 1.280000e+02 : f32
    %4 = vector.broadcast %cst_1 : f32 to vector<32x1xf32>
    %5 = arith.divf %3, %4 : vector<32x1xf32>
    %cst_2 = arith.constant 9.99999997E-7 : f32
    %6 = vector.broadcast %cst_2 : f32 to vector<32x1xf32>
    %7 = arith.addf %5, %6 : vector<32x1xf32>
    %8 = math.rsqrt %7 : vector<32x1xf32>
    %9 = vector.broadcast %8 : vector<32x1xf32> to vector<32x128xf32>
    %10 = arith.mulf %0, %9 : vector<32x128xf32>
    %c0_3 = arith.constant 0 : index
    %c0_4 = arith.constant 0 : index
    %11 = vector.load %arg1[%c0_3, %c0_4] : memref<1x128xf32, #tpu.memory_space<vmem>>, vector<1x128xf32>
    %12 = vector.broadcast %11 : vector<1x128xf32> to vector<32x128xf32>
    %13 = arith.mulf %10, %12 : vector<32x128xf32>
    %14 = arith.truncf %13 : vector<32x128xf32> to vector<32x128xbf16>
    %c0_5 = arith.constant 0 : index
    %c0_6 = arith.constant 0 : index
    %15 = vector.load %arg2[%c0_5, %c0_6] : memref<128x256xbf16, #tpu.memory_space<vmem>>, vector<128x256xbf16>
    %cst_7 = arith.constant dense<0.000000e+00> : vector<32x256xf32>
    %16 = tpu.matmul %14, %15, %cst_7 {dimension_numbers = #tpu.dot_dimension_numbers<[1], [0], [0], [1], [0, 0, 1, 1], [], []>} : vector<32x128xbf16>, vector<128x256xbf16>, vector<32x256xf32> -> vector<32x256xf32>
    %c0_8 = arith.constant 0 : index
    %c0_9 = arith.constant 0 : index
    %17 = vector.load %arg3[%c0_8, %c0_9] : memref<32x1xi32, #tpu.memory_space<vmem>>, vector<32x1xi32>
    %c-1_i32 = arith.constant -1 : i32
    %18 = vector.broadcast %c-1_i32 : i32 to vector<32x1xi32>
    %19 = arith.cmpi ne, %17, %18 : vector<32x1xi32>
    %20 = arith.extui %19 : vector<32x1xi1> to vector<32x1xi32>
    %21 = arith.sitofp %20 : vector<32x1xi32> to vector<32x1xf32>
    %cst_10 = arith.constant dense<0xFF800000> : vector<32xf32>
    %22 = vector.multi_reduction <maximumf>, %16, %cst_10 [1] : vector<32x256xf32> to vector<32xf32>
    %23 = vector.shape_cast %22 : vector<32xf32> to vector<32x1xf32>
    %24 = vector.broadcast %23 : vector<32x1xf32> to vector<32x256xf32>
    %25 = arith.subf %16, %24 : vector<32x256xf32>
    %26 = math.exp %25 : vector<32x256xf32>
    %cst_11 = arith.constant dense<0.000000e+00> : vector<32xf32>
    %27 = vector.multi_reduction <add>, %26, %cst_11 [1] : vector<32x256xf32> to vector<32xf32>
    %28 = vector.shape_cast %27 : vector<32xf32> to vector<32x1xf32>
    %29 = math.log %28 : vector<32x1xf32>
    %30 = arith.addf %23, %29 : vector<32x1xf32>
    %31 = tpu.iota {dimensions = array<i32: 1>} : vector<32x256xi32>
    %32 = vector.broadcast %17 : vector<32x1xi32> to vector<32x256xi32>
    %33 = arith.cmpi eq, %31, %32 : vector<32x256xi32>
    %cst_12 = arith.constant 0.000000e+00 : f32
    %34 = vector.broadcast %cst_12 : f32 to vector<32x256xf32>
    %35 = arith.select %33, %16, %34 : vector<32x256xi1>, vector<32x256xf32>
    %cst_13 = arith.constant dense<0.000000e+00> : vector<32xf32>
    %36 = vector.multi_reduction <add>, %35, %cst_13 [1] : vector<32x256xf32> to vector<32xf32>
    %37 = vector.shape_cast %36 : vector<32xf32> to vector<32x1xf32>
    %38 = arith.subf %30, %37 : vector<32x1xf32>
    %39 = vector.broadcast %23 : vector<32x1xf32> to vector<32x256xf32>
    %40 = arith.cmpf oeq, %16, %39 : vector<32x256xf32>
    %c256_i32 = arith.constant 256 : i32
    %41 = vector.broadcast %c256_i32 : i32 to vector<32x256xi32>
    %42 = arith.select %40, %31, %41 : vector<32x256xi1>, vector<32x256xi32>
    %cst_14 = arith.constant dense<2147483647> : vector<32xi32>
    %43 = vector.multi_reduction <minsi>, %42, %cst_14 [1] : vector<32x256xi32> to vector<32xi32>
    %44 = vector.shape_cast %43 : vector<32xi32> to vector<32x1xi32>
    %45 = arith.cmpi eq, %44, %17 : vector<32x1xi32>
    %46 = arith.extui %45 : vector<32x1xi1> to vector<32x1xi32>
    %47 = arith.sitofp %46 : vector<32x1xi32> to vector<32x1xf32>
    %48 = arith.mulf %47, %21 : vector<32x1xf32>
    %49 = arith.mulf %38, %21 : vector<32x1xf32>
    %50 = vector.shape_cast %49 : vector<32x1xf32> to vector<1x32x1xf32>
    %cst_15 = arith.constant dense<0.000000e+00> : vector<1xf32>
    %51 = vector.multi_reduction <add>, %50, %cst_15 [1, 2] : vector<1x32x1xf32> to vector<1xf32>
    %52 = vector.shape_cast %51 : vector<1xf32> to vector<1x1x1xf32>
    %53 = vector.extract %52[0, 0, 0] : f32 from vector<1x1x1xf32>
    %c0_16 = arith.constant 0 : index
    %54 = memref.load %arg4[%c0_16] : memref<3xf32, #tpu.memory_space<smem>>
    memref.store %53, %arg4[%c0_16] : memref<3xf32, #tpu.memory_space<smem>>
    %55 = vector.shape_cast %21 : vector<32x1xf32> to vector<1x32x1xf32>
    %cst_17 = arith.constant dense<0.000000e+00> : vector<1xf32>
    %56 = vector.multi_reduction <add>, %55, %cst_17 [1, 2] : vector<1x32x1xf32> to vector<1xf32>
    %57 = vector.shape_cast %56 : vector<1xf32> to vector<1x1x1xf32>
    %58 = vector.extract %57[0, 0, 0] : f32 from vector<1x1x1xf32>
    %c1 = arith.constant 1 : index
    %59 = memref.load %arg4[%c1] : memref<3xf32, #tpu.memory_space<smem>>
    memref.store %58, %arg4[%c1] : memref<3xf32, #tpu.memory_space<smem>>
    %60 = vector.shape_cast %48 : vector<32x1xf32> to vector<1x32x1xf32>
    %cst_18 = arith.constant dense<0.000000e+00> : vector<1xf32>
    %61 = vector.multi_reduction <add>, %60, %cst_18 [1, 2] : vector<1x32x1xf32> to vector<1xf32>
    %62 = vector.shape_cast %61 : vector<1xf32> to vector<1x1x1xf32>
    %63 = vector.extract %62[0, 0, 0] : f32 from vector<1x1x1xf32>
    %c2 = arith.constant 2 : index
    %64 = memref.load %arg4[%c2] : memref<3xf32, #tpu.memory_space<smem>>
    memref.store %63, %arg4[%c2] : memref<3xf32, #tpu.memory_space<smem>>
    return
  }
}

</mosaic_0001>

<bundles_post_ra>
// kernel: tile.14
= control target key start
LH: loop header
LB: loop body
LE: loop exit
PB: predicated region body
PF: predicated region fallthrough
CT: control target
= control target key end

     0   :  { %vm82_vm0 = vcmask 1047556   ;;  %vm84_vm1 = vcmask 261120   ;;  %s195_s9 = smov 96   ;;  %s196_s14 = smov 32   ;;  %vm103_vm2 = vcmask 1048320   ;;  %vm124_vm3 = vcmask 785920   ;;  %s289_s0 = inlined_call_operand.vmem [shape: f32[16,4,32], index: 0, kind: input, shape index: {}]   ;;  %s290_s1 = inlined_call_operand.vmem [shape: f32[16,128], index: 1, kind: output, shape index: {}]  }
   0x1   :  { %v180_v0 = vld [vmem:[%s289_s0 + $0x1c] sm:$0xf]  ;;  %v181_v1 = vld [vmem:[%s289_s0 + $0x18] sm:$0xf]  ;;  %v182_v2 = vld [vmem:[%s289_s0 + $0x14] sm:$0xf] }
   0x2   :  { %48 = vst [vmem:[#allocation0 + $0x38] sm:$0xf] %v180_v0  ;;  %53 = vst [vmem:[#allocation0 + $0x30] sm:$0xf] %v181_v1  ;;  %v183_v3 = vld [vmem:[%s289_s0 + $0x10] sm:$0xf] }
   0x3   :  { %58 = vst [vmem:[#allocation0 + $0x28] sm:$0xf] %v182_v2  ;;  %v184_v4 = vld [vmem:[%s289_s0 + $0xc] sm:$0xf]  ;;  %v185_v5 = vld [vmem:[%s289_s0 + $0x8] sm:$0xf] }
   0x4   :  { %63 = vst [vmem:[#allocation0 + $0x20] sm:$0xf] %v183_v3  ;;  %68 = vst [vmem:[#allocation0 + $0x18] sm:$0xf] %v184_v4  ;;  %v186_v6 = vld [vmem:[%s289_s0 + $0x4] sm:$0xf] }
   0x5   :  { %73 = vst [vmem:[#allocation0 + $0x10] sm:$0xf] %v185_v5  ;;  %v78_v7 = vld [vmem:[%s289_s0] sm:$0xf]  ;;  %77 = vst [vmem:[#allocation0 + $0x8] sm:$0xf] %v186_v6 }
   0x6   :  { %79 = vst [vmem:[#allocation0] sm:$0xf] %v78_v7  ;;  %v172_v8 = vld [vmem:[%s289_s0 + $0x3c] sm:$0xf]  ;;  %v173_v9 = vld [vmem:[%s289_s0 + $0x38] sm:$0xf] }
   0x7   :  { %8 = vst [vmem:[#allocation0 + $0x78] sm:$0xf] %v172_v8  ;;  %13 = vst [vmem:[#allocation0 + $0x70] sm:$0xf] %v173_v9  ;;  %v174_v10 = vld [vmem:[%s289_s0 + $0x34] sm:$0xf] }
   0x8   :  { %v175_v11 = vld [vmem:[%s289_s0 + $0x30] sm:$0xf]  ;;  %v176_v12 = vld [vmem:[%s289_s0 + $0x2c] sm:$0xf]  ;;  %18 = vst [vmem:[#allocation0 + $0x68] sm:$0xf] %v174_v10 }
   0x9   :  { %23 = vst [vmem:[#allocation0 + $0x60] sm:$0xf] %v175_v11  ;;  %28 = vst [vmem:[#allocation0 + $0x58] sm:$0xf] %v176_v12  ;;  %v177_v13 = vld [vmem:[%s289_s0 + $0x28] sm:$0xf] }
   0xa   :  { %v178_v14 = vld [vmem:[%s289_s0 + $0x24] sm:$0xf]  ;;  %v179_v15 = vld [vmem:[%s289_s0 + $0x20] sm:$0xf]  ;;  %33 = vst [vmem:[#allocation0 + $0x50] sm:$0xf] %v177_v13 }
   0xb   :  { %38 = vst [vmem:[#allocation0 + $0x48] sm:$0xf] %v178_v14  ;;  %43 = vst [vmem:[#allocation0 + $0x40] sm:$0xf] %v179_v15  ;;  %s194_s0 = smov 64   ;;  %vm145_vm4 = vcmask 523520  }
   0xc   :  { %v119_v16 = vld [vmem:[#allocation0 + $0x2] ss:$8 sm:$0xf0]   ;;  %v98_v17 = vld [vmem:[#allocation0 + $0x3] ss:$8 sm:$0xf0]  }
   0xd   :  { %v117_v18 = vld [vmem:[#allocation0 + $0x2] ss:$8 sm:$0xf]   ;;  %v96_v19 = vld [vmem:[#allocation0 + $0x3] ss:$8 sm:$0xf]  }
   0xe   :  { %v121_v20 = vsel %vm82_vm0, %v119_v16, %v117_v18  ;;  %v100_v21 = vsel %vm82_vm0, %v98_v17, %v96_v19  ;;  %v138_v24 = vld [vmem:[#allocation0 + $0x1] ss:$8 sm:$0xf]   ;;  %v80_v32 = vld [vmem:[#allocation0] ss:$8 sm:$0xf]  }
   0xf   :  { %122 = vrot.lane.b32.xlu1 %v121_v20, %s194_s0  ;;  %101 = vrot.lane.b32.xlu0 %v100_v21, %s195_s9  ;;  %v140_v25 = vld [vmem:[#allocation0 + $0x1] ss:$8 sm:$0xf0]   ;;  %v81_v33 = vld [vmem:[#allocation0] ss:$8 sm:$0xf0]  }
  0x10   :  { %v129_v22 = vld [vmem:[#allocation0 + $0x42] ss:$8 sm:$0xf0]   ;;  %v108_v23 = vld [vmem:[#allocation0 + $0x43] ss:$8 sm:$0xf0]   ;;  %v83_v34 = vsel %vm82_vm0, %v81_v33, %v80_v32  ;;  %v142_v38 = vsel %vm82_vm0, %v140_v25, %v138_v24 }
  0x11   :  { %v150_v31 = vld [vmem:[#allocation0 + $0x41] ss:$8 sm:$0xf0]   ;;  %v89_v36 = vld [vmem:[#allocation0 + $0x40] ss:$8 sm:$0xf0]  }
  0x12   :  { %v127_v26 = vld [vmem:[#allocation0 + $0x42] ss:$8 sm:$0xf]   ;;  %v106_v27 = vld [vmem:[#allocation0 + $0x43] ss:$8 sm:$0xf]  }
  0x13   :  { %v131_v28 = vsel %vm82_vm0, %v129_v22, %v127_v26  ;;  %v110_v29 = vsel %vm82_vm0, %v108_v23, %v106_v27  ;;  %v148_v30 = vld [vmem:[#allocation0 + $0x41] ss:$8 sm:$0xf]   ;;  %v87_v35 = vld [vmem:[#allocation0 + $0x40] ss:$8 sm:$0xf]  }
  0x14   :  { %132 = vrot.lane.b32.xlu1 %v131_v28, %s194_s0  ;;  %111 = vrot.lane.b32.xlu0 %v110_v29, %s195_s9  ;;  %v152_v37 = vsel %vm82_vm0, %v150_v31, %v148_v30  ;;  %85 = vst.msk [vmem:[%s290_s1] sm:$0xff] %vm84_vm1, %v83_v34   ;;  %v91_v39 = vsel %vm82_vm0, %v89_v36, %v87_v35 }
  0x15   :  { %187 = vst.msk [vmem:[%s290_s1 + $0x8] sm:$0xff] %vm84_vm1, %v91_v39  }
  0x18   :  { %153 = vrot.lane.b32.xlu1 %v152_v37, %s196_s14  ;;  %143 = vrot.lane.b32.xlu0 %v142_v38, %s196_s14 }
  0x81   :  { %v123_v40 = vpop.permute.xlu1 %122   ;;  %v102_v41 = vpop.permute.xlu0 %101  }
  0x82   :  { %104 = vst.msk [vmem:[%s290_s1] sm:$0xff] %vm103_vm2, %v102_v41  }
  0x83   :  { %125 = vst.msk [vmem:[%s290_s1] sm:$0xff] %vm124_vm3, %v123_v40  }
  0x86   :  { %v133_v42 = vpop.permute.xlu1 %132   ;;  %v112_v43 = vpop.permute.xlu0 %111  }
  0x87   :  { %188 = vst.msk [vmem:[%s290_s1 + $0x8] sm:$0xff] %vm103_vm2, %v112_v43  }
  0x88   :  { %189 = vst.msk [vmem:[%s290_s1 + $0x8] sm:$0xff] %vm124_vm3, %v133_v42  }
  0x8a   :  { %v154_v44 = vpop.permute.xlu1 %153   ;;  %v144_v45 = vpop.permute.xlu0 %143  }
  0x8b   :  { %190 = vst.msk [vmem:[%s290_s1 + $0x8] sm:$0xff] %vm145_vm4, %v154_v44   ;;  %146 = vst.msk [vmem:[%s290_s1] sm:$0xff] %vm145_vm4, %v144_v45  }

// kernel: causal_lm_forward.5
= control target key start
LH: loop header
LB: loop body
LE: loop exit
PB: predicated region body
PF: predicated region fallthrough
CT: control target
= control target key end

     0   :  { %s946_s0 = inlined_call_operand.vmem [shape: f32[32,128], index: 0, kind: input, shape index: {}]   ;;  %s947_s1 = inlined_call_operand.vmem [shape: f32[1,128], index: 1, kind: input, shape index: {}]   ;;  %s948_s2 = inlined_call_operand.vmem [shape: bf16[128,256], index: 2, kind: input, shape index: {}]   ;;  %s949_s3 = inlined_call_operand.vmem [shape: s32[32,1], index: 3, kind: input, shape index: {}]   ;;  %s950_s4 = inlined_call_operand.vmem [shape: f32[3], index: 4, kind: output, shape index: {}]  }
   0x1   :  { %v660_v0 = vld [vmem:[%s946_s0 + $0x10] sm:$0xff]  ;;  %v665_v1 = vld [vmem:[%s946_s0] sm:$0xff]  ;;  %v670_v2 = vld [vmem:[%s946_s0 + $0x18] sm:$0xff] }
   0x2   :  { %v25_v3 = vmul.f32 %v660_v0, %v660_v0  ;;  %v23_v4 = vmul.f32 %v665_v1, %v665_v1  ;;  %v679_v5 = vld [vmem:[%s946_s0 + $0x8] sm:$0xff]  ;;  %v26_v8 = vmul.f32 %v670_v2, %v670_v2  ;;  %v562_v10 = vld [vmem:[%s948_s2 + $0x14] ss:$8 sps:$4 sm:$0xff]   ;;  %v564_v11 = vld [vmem:[%s948_s2 + $0x10] ss:$8 sps:$4 sm:$0xff]  }
   0x3   :  { %v559_v6 = vld [vmem:[%s948_s2 + $0x4] ss:$8 sps:$4 sm:$0xff]   ;;  %v561_v7 = vld [vmem:[%s948_s2] ss:$8 sps:$4 sm:$0xff]   ;;  %v24_v9 = vmul.f32 %v679_v5, %v679_v5 }
   0x4   :  { %31 = vadd.xlane.f32.xlu1 %v25_v3  ;;  %27 = vadd.xlane.f32.xlu0 %v23_v4 }
   0x5   :  { %161 = vmatprep.subr.bf16.mxu0 %v559_v6  ;;  %532 = vmatprep.subr.bf16.mxu1 %v559_v6 }
   0x6   :  { %162 = vmatpush1.bf16.msra.mxu0 %v561_v7  ;;  %540 = vmatpush1.bf16.msra.mxu1 %v561_v7 }
   0x7   :  { %163 = vmatprep.subr.bf16.mxu0 %v562_v10  ;;  %533 = vmatprep.subr.bf16.mxu1 %v562_v10 }
   0x8   :  { %33 = vadd.xlane.f32.xlu1 %v26_v8  ;;  %29 = vadd.xlane.f32.xlu0 %v24_v9 }
   0x9   :  { %9 = vsyncpa [#allocation3], 0  ;;  %v565_v12 = vld [vmem:[%s948_s2 + $0x24] ss:$8 sps:$4 sm:$0xff]   ;;  %v567_v13 = vld [vmem:[%s948_s2 + $0x20] ss:$8 sps:$4 sm:$0xff]  }
   0xa   :  { %164 = vmatpush1.bf16.msra.mxu0 %v564_v11  ;;  %541 = vmatpush1.bf16.msra.mxu1 %v564_v11  ;;  %v568_v14 = vld [vmem:[%s948_s2 + $0x34] ss:$8 sps:$4 sm:$0xff]   ;;  %v570_v15 = vld [vmem:[%s948_s2 + $0x30] ss:$8 sps:$4 sm:$0xff]   ;;  %v571_v16 = vld [vmem:[%s948_s2 + $0x44] ss:$8 sps:$4 sm:$0xff]  }
   0xb   :  { %165 = vmatprep.subr.bf16.mxu0 %v565_v12  ;;  %534 = vmatprep.subr.bf16.mxu1 %v565_v12  ;;  %v573_v17 = vld [vmem:[%s948_s2 + $0x40] ss:$8 sps:$4 sm:$0xff]   ;;  %v574_v18 = vld [vmem:[%s948_s2 + $0x54] ss:$8 sps:$4 sm:$0xff]   ;;  %v576_v19 = vld [vmem:[%s948_s2 + $0x50] ss:$8 sps:$4 sm:$0xff]  }
   0xc   :  { %v577_v20 = vld [vmem:[%s948_s2 + $0x64] ss:$8 sps:$4 sm:$0xff]   ;;  %v629_v21 = vmov 0   ;;  %v579_v22 = vld [vmem:[%s948_s2 + $0x60] ss:$8 sps:$4 sm:$0xff]   ;;  %s498_s11 = sshll.u32 %s950_s4, 4  ;;  %s499_s11 = int_to_ptr.vmem [resolvable:$true] %s498_s11 }
   0xd   :  { %193 = vmatprep.mubr.bf16.mxu0 %v629_v21  ;;  %203 = vmatprep.mubr.bf16.mxu1 %v629_v21  ;;  %v580_v23 = vld [vmem:[%s948_s2 + $0x74] ss:$8 sps:$4 sm:$0xff]   ;;  %v582_v24 = vld [vmem:[%s948_s2 + $0x70] ss:$8 sps:$4 sm:$0xff]   ;;  %v507_v42 = vld [vmem:[%s947_s1] ss:$0 sm:$0xff]  ;;  %p620_p1 = scmp.lt.s32.totalorder %s499_s11, %s499_s11 }
   0xe   :  { %166 = vmatpush1.bf16.msra.mxu0 %v567_v13  ;;  %542 = vmatpush1.bf16.msra.mxu1 %v567_v13  ;;  %s615_s14 = scalar_lea.vmem %s499_s11, 16 }
   0xf   :  { %167 = vmatprep.subr.bf16.mxu0 %v568_v14  ;;  %535 = vmatprep.subr.bf16.mxu1 %v568_v14  ;;  %p616_p0 = scmp.ne.s32.totalorder %s499_s11, %s615_s14  ;;  %p621_p2 = scmp.lt.s32.totalorder %s615_s14, %s615_s14 }
  0x10   :  { %558 = vset.pattern.permute.xlu1 %v629_v21  ;;  %557 = vset.pattern.permute.xlu0 %v629_v21 }
  0x11   :  { %p622_p3 = por %p621_p2, %p620_p1 }
  0x12   :  { %168 = vmatpush1.bf16.msra.mxu0 %v570_v15  ;;  %543 = vmatpush1.bf16.msra.mxu1 %v570_v15 }
  0x13   :  { %169 = vmatprep.subr.bf16.mxu0 %v571_v16  ;;  %536 = vmatprep.subr.bf16.mxu1 %v571_v16  ;;  %p623_p4 = pnand %p622_p3, %p616_p0 }
  0x16   :  { %170 = vmatpush1.bf16.msra.mxu0 %v573_v17  ;;  %544 = vmatpush1.bf16.msra.mxu1 %v573_v17 }
  0x17   :  { %171 = vmatprep.subr.bf16.mxu0 %v574_v18  ;;  %537 = vmatprep.subr.bf16.mxu1 %v574_v18 }
  0x1a   :  { %172 = vmatpush1.bf16.msra.mxu0 %v576_v19  ;;  %545 = vmatpush1.bf16.msra.mxu1 %v576_v19 }
  0x1b   :  { %173 = vmatprep.subr.bf16.mxu0 %v577_v20  ;;  %538 = vmatprep.subr.bf16.mxu1 %v577_v20 }
  0x1e   :  { %174 = vmatpush1.bf16.msra.mxu0 %v579_v22  ;;  %546 = vmatpush1.bf16.msra.mxu1 %v579_v22 }
  0x1f   :  { %175 = vmatprep.subr.bf16.mxu0 %v580_v23  ;;  %539 = vmatprep.subr.bf16.mxu1 %v580_v23 }
  0x22   :  { %176 = vmatpush1.bf16.msra.mxu0 %v582_v24  ;;  %547 = vmatpush1.bf16.msra.mxu1 %v582_v24 }
  0x91   :  { %v32_v25 = vpop.xlane.xlu1 %31  ;;  %v28_v26 = vpop.xlane.xlu0 %27 }
  0x92   :  { %v38_v27 = vmul.f32 0.0078125, %v32_v25  ;;  %v36_v28 = vmul.f32 0.0078125, %v28_v26 }
  0x94   :  { %v42_v29 = vadd.f32 1e-06, %v38_v27  ;;  %v40_v30 = vadd.f32 1e-06, %v36_v28 }
  0x95   :  { %v34_v31 = vpop.xlane.xlu1 %33  ;;  %v30_v32 = vpop.xlane.xlu0 %29 }
  0x96   :  { %583 = vrsqrt.f32 %v42_v29  ;;  %v39_v33 = vmul.f32 0.0078125, %v34_v31  ;;  %v37_v34 = vmul.f32 0.0078125, %v30_v32 }
  0x97   :  { %585 = vrsqrt.f32 %v40_v30 }
  0x98   :  { %v43_v35 = vadd.f32 1e-06, %v39_v33  ;;  %v41_v36 = vadd.f32 1e-06, %v37_v34 }
  0x9a   :  { %587 = vrsqrt.f32 %v43_v35 }
  0x9b   :  { %589 = vrsqrt.f32 %v41_v36 }
  0xa0   :  { %v584_v37 = vpop.eup %583 }
  0xa1   :  { %v586_v38 = vpop.eup %585  ;;  %v50_v39 = vmul.f32 %v584_v37, %v660_v0  ;;  %v767_v0 = vld [vmem:[%s949_s3 + $0x8] sm:$0xff] }
  0xa2   :  { %v48_v41 = vmul.f32 %v586_v38, %v665_v1  ;;  %v773_v1 = vld [vmem:[%s949_s3 + $0x10] sm:$0xff] }
  0xa3   :  { %v61_v45 = vmul.f32 %v507_v42, %v50_v39 }
  0xa4   :  { %v588_v40 = vpop.eup %587  ;;  %v59_v48 = vmul.f32 %v507_v42, %v48_v41 }
  0xa5   :  { %v590_v43 = vpop.eup %589  ;;  %v51_v44 = vmul.f32 %v588_v40, %v670_v2  ;;  %v290_v2 = vlaneseq }
  0xa6   :  { %v49_v46 = vmul.f32 %v590_v43, %v679_v5 }
  0xa7   :  { %v62_v47 = vmul.f32 %v507_v42, %v51_v44  ;;  %v776_v3 = vand.u32 127, %v290_v2 }
  0xa8   :  { %v60_v49 = vmul.f32 %v507_v42, %v49_v46 }
  0xa9   :  { %v64_v50 = vpack.c.bf16 %v62_v47, %v61_v45  ;;  %v779_v4 = vadd.s32 128, %v776_v3 }
  0xaa   :  { %v63_v51 = vpack.c.bf16 %v60_v49, %v59_v48 }
  0xab   :  { %204 = vmatmul.mubr.bf16.vlgmr.msra.gmra.mrb[0].mxu1 %v64_v50 }
  0xac   :  { %194 = vmatmul.mubr.bf16.vlgmr.msra.gmra.mrb[0].mxu0 %v63_v51 }
 0x17e   :  { %v740_v52 = vpop.f32.mrb[0].mxu1 }
 0x17f   :  { %v742_v53 = vpop.f32.mrb[0].mxu0  ;;  %v744_v54 = vpop.f32.mrb[1].mxu1 }
 0x180   :  { %v746_v55 = vpop.f32.mrb[1].mxu0  ;;  %v748_v56 = vpop.f32.mrb[2].mxu1  ;;  %v236_v57 = vmax.f32 %v740_v52, %v744_v54 }
 0x181   :  { %v752_v58 = vpop.f32.mrb[2].mxu0  ;;  %v754_v59 = vpop.f32.mrb[3].mxu1  ;;  %v230_v60 = vmax.f32 %v742_v53, %v746_v55 }
 0x182   :  { %v758_v61 = vpop.f32.mrb[3].mxu0  ;;  %v239_v62 = vmax.f32 %v748_v56, %v754_v59 }
 0x183   :  { %231 = vmax.xlane.f32.xlu0 %v230_v60  ;;  %v233_v63 = vmax.f32 %v752_v58, %v758_v61 }
 0x185   :  { %234 = vmax.xlane.f32.xlu1 %v233_v63 }
 0x187   :  { %237 = vmax.xlane.f32.xlu0 %v236_v57 }
 0x189   :  { %240 = vmax.xlane.f32.xlu1 %v239_v62 }
 0x19a   :  { %297 = vperm.xlu1 %558, %v767_v0  }
 0x19e   :  { %300 = vperm.xlu1 %558, %v773_v1  }
 0x210   :  { %v781_v5 = vpop.xlane.xlu0 %231 }
 0x211   :  { %v242_v6 = vsub.f32 %v742_v53, %v781_v5  ;;  %v243_v7 = vsub.f32 %v746_v55, %v781_v5  ;;  %vm337_vm0 = vcmp.eq.f32.partialorder %v742_v53, %v781_v5  ;;  %vm338_vm1 = vcmp.eq.f32.partialorder %v746_v55, %v781_v5 }
 0x212   :  { %v791_v8 = vpop.xlane.xlu1 %234  ;;  %v345_v9 = vsel %vm337_vm0, %v776_v3, 256  ;;  %v346_v10 = vsel %vm338_vm1, %v779_v4, 256 }
 0x213   :  { %v250_v11 = vmul.f32 1.442695, %v242_v6  ;;  %v252_v12 = vmul.f32 1.442695, %v243_v7  ;;  %v244_v13 = vsub.f32 %v752_v58, %v791_v8  ;;  %v245_v14 = vsub.f32 %v758_v61, %v791_v8 }
 0x214   :  { %v799_v15 = vpop.xlane.xlu0 %237  ;;  %vm353_vm2 = vcmp.lt.s32.totalorder %v345_v9, %v346_v10  ;;  %vm339_vm3 = vcmp.eq.f32.partialorder %v752_v58, %v791_v8  ;;  %vm340_vm4 = vcmp.eq.f32.partialorder %v758_v61, %v791_v8 }
 0x215   :  { %591 = vpow2.f32 %v250_v11  ;;  %v254_v16 = vmul.f32 1.442695, %v244_v13  ;;  %v256_v17 = vmul.f32 1.442695, %v245_v14  ;;  %v246_v18 = vsub.f32 %v740_v52, %v799_v15  ;;  %v858_v13 = vld [vmem:[%s949_s3 + $0x18] sm:$0xff] }
 0x216   :  { %593 = vpow2.f32 %v252_v12  ;;  %v247_v19 = vsub.f32 %v744_v54, %v799_v15  ;;  %v809_v20 = vpop.xlane.xlu1 %240  ;;  %v811_v21 = vsel %vm353_vm2, %v345_v9, %v346_v10  ;;  %v347_v22 = vsel %vm339_vm3, %v776_v3, 256 }
 0x217   :  { %595 = vpow2.f32 %v254_v16  ;;  %v258_v23 = vmul.f32 1.442695, %v246_v18  ;;  %v248_v24 = vsub.f32 %v748_v56, %v809_v20  ;;  %v249_v25 = vsub.f32 %v754_v59, %v809_v20 }
 0x218   :  { %597 = vpow2.f32 %v256_v17  ;;  %v260_v26 = vmul.f32 1.442695, %v247_v19  ;;  %v356_v27 = vshra.s32 %v811_v21, 16  ;;  %v348_v28 = vsel %vm340_vm4, %v779_v4, 256 }
 0x219   :  { %599 = vpow2.f32 %v258_v23  ;;  %v262_v29 = vmul.f32 1.442695, %v248_v24  ;;  %v264_v30 = vmul.f32 1.442695, %v249_v25  ;;  %vm369_vm5 = vcmp.lt.s32.totalorder %v347_v22, %v348_v28 }
 0x21a   :  { %601 = vpow2.f32 %v260_v26  ;;  %v823_v31 = vcvt.s32.f32 %v356_v27  ;;  %v298_v32 = vpop.permute.xlu1 %297  ;;  %v825_v33 = vsel %vm369_vm5, %v347_v22, %v348_v28  ;;  %vm341_vm6 = vcmp.eq.f32.partialorder %v740_v52, %v799_v15 }
 0x21b   :  { %603 = vpow2.f32 %v262_v29  ;;  %vm307_vm7 = vcmp.eq.s32.totalorder %v776_v3, %v298_v32  ;;  %vm308_vm8 = vcmp.eq.s32.totalorder %v779_v4, %v298_v32  ;;  %v372_v34 = vshra.s32 %v825_v33, 16 }
 0x21c   :  { %605 = vpow2.f32 %v264_v30  ;;  %359 = vmin.xlane.f32.xlu0 %v823_v31  ;;  %vm342_vm9 = vcmp.eq.f32.partialorder %v744_v54, %v799_v15  ;;  %v349_v35 = vsel %vm341_vm6, %v776_v3, 256  ;;  %vm343_vm10 = vcmp.eq.f32.partialorder %v748_v56, %v809_v20 }
 0x21d   :  { %v838_v36 = vcvt.s32.f32 %v372_v34  ;;  %v350_v37 = vsel %vm342_vm9, %v779_v4, 256  ;;  %vm344_vm11 = vcmp.eq.f32.partialorder %v754_v59, %v809_v20  ;;  %v351_v38 = vsel %vm343_vm10, %v776_v3, 256 }
 0x21e   :  { %vm385_vm12 = vcmp.lt.s32.totalorder %v349_v35, %v350_v37  ;;  %v301_v39 = vpop.permute.xlu1 %300  ;;  %v352_v40 = vsel %vm344_vm11, %v779_v4, 256  ;;  %v315_v41 = vsel %vm307_vm7, %v752_v58, 0.0  ;;  %v316_v42 = vsel %vm308_vm8, %v758_v61, 0.0 }
 0x21f   :  { %v592_v43 = vpop.eup %591  ;;  %375 = vmin.xlane.f32.xlu1 %v838_v36  ;;  %v386_v44 = vsel %vm385_vm12, %v349_v35, %v350_v37  ;;  %vm309_vm13 = vcmp.eq.s32.totalorder %v776_v3, %v301_v39  ;;  %vm310_vm14 = vcmp.eq.s32.totalorder %v779_v4, %v301_v39  ;;  %vm401_vm15 = vcmp.lt.s32.totalorder %v351_v38, %v352_v40 }
 0x220   :  { %v594_v45 = vpop.eup %593  ;;  %v388_v46 = vshra.s32 %v386_v44, 16  ;;  %v850_v47 = vsel %vm401_vm15, %v351_v38, %v352_v40  ;;  %v324_v48 = vadd.f32 %v316_v42, %v315_v41  ;;  %v317_v57 = vsel %vm309_vm13, %v740_v52, 0.0  ;;  %v864_v52 = vld [vmem:[%s949_s3] sm:$0xff] }
 0x221   :  { %v596_v49 = vpop.eup %595  ;;  %v404_v50 = vshra.s32 %v850_v47, 16  ;;  %v266_v51 = vadd.f32 %v594_v45, %v592_v43  ;;  %v318_v58 = vsel %vm310_vm14, %v744_v54, 0.0  ;;  %v387_v16 = vand.u32 65535, %v386_v44 }
 0x222   :  { %v598_v60 = vpop.eup %597  ;;  %v390_v61 = vcvt.s32.f32 %v388_v46  ;;  %v327_v62 = vadd.f32 %v318_v58, %v317_v57  ;;  %v355_v32 = vand.u32 65535, %v811_v21  ;;  %vm219_vm8 = vcmp.ne.s32.totalorder %v767_v0, 4294967295 }
 0x223   :  { %v600_v63 = vpop.eup %599  ;;  %v406_v2 = vcvt.s32.f32 %v404_v50  ;;  %v269_v6 = vadd.f32 %v598_v60, %v596_v49  ;;  %v389_v18 = vcvt.s32.f32 %v387_v16  ;;  %vm220_vm9 = vcmp.ne.s32.totalorder %v773_v1, 4294967295 }
 0x224   :  { %v602_v7 = vpop.eup %601  ;;  %391 = vmin.xlane.f32.xlu0 %v390_v61  ;;  %vm221_vm10 = vcmp.ne.s32.totalorder %v858_v13, 4294967295  ;;  %vm218_vm11 = vcmp.ne.s32.totalorder %v864_v52, 4294967295  ;;  %vm437_vm12 = vcmask 7168  }
 0x225   :  { %v604_v9 = vpop.eup %603  ;;  %407 = vmin.xlane.f32.xlu1 %v406_v2  ;;  %v272_v10 = vadd.f32 %v602_v7, %v600_v63 }
 0x226   :  { %v606_v11 = vpop.eup %605 }
 0x227   :  { %v275_v12 = vadd.f32 %v606_v11, %v604_v9 }
 0x236   :  { %303 = vperm.xlu1 %558, %v858_v13  }
 0x23a   :  { %294 = vperm.xlu0 %557, %v864_v52  }
 0x259   :  { %270 = vadd.xlane.f32.xlu0 %v269_v6 }
 0x25a   :  { %267 = vadd.xlane.f32.xlu1 %v266_v51 }
 0x25d   :  { %325 = vadd.xlane.f32.xlu0 %v324_v48 }
 0x25e   :  { %273 = vadd.xlane.f32.xlu1 %v272_v10 }
 0x2a9   :  { %v867_v54 = vpop.xlane.xlu0 %359 }
 0x2aa   :  { %vm361_vm5 = vcmp.eq.f32.partialorder %v823_v31, %v867_v54  ;;  %v630_v31 = vmov 0.0  }
 0x2ab   :  { %v900_v35 = vsel %vm220_vm9, 1.0, %v630_v31  ;;  %v904_v37 = vsel %vm221_vm10, 1.0, %v630_v31 }
 0x2ac   :  { %v869_v14 = vpop.xlane.xlu1 %375  ;;  %v459_v40 = vsel %vm437_vm12, %v900_v35, 0.0  ;;  %v461_v42 = vsel %vm437_vm12, %v904_v37, 0.0 }
 0x2ad   :  { %vm377_vm6 = vcmp.eq.f32.partialorder %v838_v36, %v869_v14  ;;  %v524_v36 = vsel %vm218_vm11, 1.0, %v630_v31  ;;  %v382_v11 = vcvt.f32.s32 %v869_v14 }
 0x2ae   :  { %v456_v38 = vsel %vm437_vm12, %v524_v36, 0.0 }
 0x2b1   :  { %v871_v17 = vpop.xlane.xlu0 %391 }
 0x2b2   :  { %v873_v19 = vpop.xlane.xlu1 %407  ;;  %vm393_vm0 = vcmp.eq.f32.partialorder %v390_v61, %v871_v17  ;;  %v398_v60 = vcvt.f32.s32 %v871_v17 }
 0x2b3   :  { %v394_v22 = vsel %vm393_vm0, %v389_v18, inf  ;;  %vm409_vm7 = vcmp.eq.f32.partialorder %v406_v2, %v873_v19  ;;  %v366_v2 = vcvt.f32.s32 %v867_v54  ;;  %v414_v54 = vcvt.f32.s32 %v873_v19 }
 0x2b4   :  { %395 = vmin.xlane.f32.xlu0 %v394_v22  ;;  %v399_v9 = vshll.u32 %v398_v60, 16 }
 0x2b5   :  { %v367_v18 = vshll.u32 %v366_v2, 16 }
 0x2b6   :  { %v304_v23 = vpop.permute.xlu1 %303 }
 0x2b7   :  { %vm311_vm1 = vcmp.eq.s32.totalorder %v776_v3, %v304_v23  ;;  %vm312_vm2 = vcmp.eq.s32.totalorder %v779_v4, %v304_v23 }
 0x2b8   :  { %328 = vadd.xlane.f32.xlu0 %v327_v62  ;;  %v319_v24 = vsel %vm311_vm1, %v748_v56, 0.0  ;;  %v320_v25 = vsel %vm312_vm2, %v754_v59, 0.0  ;;  %v357_v56 = vcvt.s32.f32 %v355_v32  ;;  %v371_v59 = vand.u32 65535, %v825_v33 }
 0x2b9   :  { %v295_v26 = vpop.permute.xlu0 %294  ;;  %v330_v27 = vadd.f32 %v320_v25, %v319_v24  ;;  %v897_v33 = vsel %vm219_vm8, 1.0, %v630_v31 }
 0x2ba   :  { %vm305_vm3 = vcmp.eq.s32.totalorder %v776_v3, %v295_v26  ;;  %vm306_vm4 = vcmp.eq.s32.totalorder %v779_v4, %v295_v26  ;;  %v362_v34 = vsel %vm361_vm5, %v357_v56, inf  ;;  %v373_v3 = vcvt.s32.f32 %v371_v59 }
 0x2bb   :  { %v313_v28 = vsel %vm305_vm3, %v742_v53, 0.0  ;;  %v314_v29 = vsel %vm306_vm4, %v746_v55, 0.0  ;;  %v403_v53 = vand.u32 65535, %v850_v47  ;;  %v457_v39 = vsel %vm437_vm12, %v897_v33, 0.0 }
 0x2bc   :  { %v321_v30 = vadd.f32 %v314_v29, %v313_v28  ;;  %v378_v55 = vsel %vm377_vm6, %v373_v3, inf  ;;  %v458_v41 = vadd.f32 %v457_v39, %v456_v38  ;;  %v383_v26 = vshll.u32 %v382_v11, 16 }
 0x2bd   :  { %v405_v4 = vcvt.s32.f32 %v403_v53 }
 0x2be   :  { %322 = vadd.xlane.f32.xlu1 %v321_v30  ;;  %v460_v43 = vadd.f32 %v459_v40, %v458_v41 }
 0x2bf   :  { %v410_v21 = vsel %vm409_vm7, %v405_v4, inf }
 0x2c0   :  { %v462_v44 = vadd.f32 %v461_v42, %v460_v43 }
 0x2c2   :  { %276 = vadd.xlane.f32.xlu1 %v275_v12 }
 0x2c6   :  { %363 = vmin.xlane.f32.xlu1 %v362_v34  ;;  %v415_v34 = vshll.u32 %v414_v54, 16 }
 0x2ca   :  { %379 = vmin.xlane.f32.xlu1 %v378_v55 }
 0x2ce   :  { %411 = vmin.xlane.f32.xlu1 %v410_v21 }
 0x2d2   :  { %331 = vadd.xlane.f32.xlu1 %v330_v27 }
 0x2d6   :  { %463 = vadd.xlane.f32.xlu1 %v462_v44 }
 0x2e6   :  { %v271_v45 = vpop.xlane.xlu0 %270 }
 0x2e7   :  { %v268_v46 = vpop.xlane.xlu1 %267  ;;  %607 = vlog2.f32 %v271_v45 }
 0x2e8   :  { %609 = vlog2.f32 %v268_v46 }
 0x2ea   :  { %v326_v48 = vpop.xlane.xlu0 %325 }
 0x2eb   :  { %v274_v47 = vpop.xlane.xlu1 %273 }
 0x2ec   :  { %611 = vlog2.f32 %v274_v47 }
 0x2f1   :  { %v608_v49 = vpop.eup %607 }
 0x2f2   :  { %v610_v50 = vpop.eup %609  ;;  %v281_v57 = vmul.f32 0.6931472, %v608_v49 }
 0x2f3   :  { %v279_v61 = vmul.f32 0.6931472, %v610_v50 }
 0x2f4   :  { %v287_v7 = vadd.f32 %v281_v57, %v791_v8 }
 0x2f5   :  { %v286_v10 = vadd.f32 %v279_v61, %v781_v5 }
 0x2f6   :  { %v612_v63 = vpop.eup %611  ;;  %v334_v24 = vsub.f32 %v287_v7, %v326_v48 }
 0x2f7   :  { %v283_v12 = vmul.f32 0.6931472, %v612_v63 }
 0x2f8   :  { %v434_v29 = vmul.f32 %v897_v33, %v334_v24 }
 0x2f9   :  { %v288_v28 = vadd.f32 %v283_v12, %v799_v15 }
 0x341   :  { %v396_v58 = vpop.xlane.xlu0 %395 }
 0x342   :  { %v397_v6 = vcvt.f32.s32 %v396_v58 }
 0x344   :  { %v400_v22 = vadd.s32 %v399_v9, %v397_v6 }
 0x345   :  { %v329_v27 = vpop.xlane.xlu0 %328 }
 0x346   :  { %vm419_vm13 = vcmp.eq.s32.totalorder %v400_v22, %v773_v1  ;;  %v335_v56 = vsub.f32 %v288_v28, %v329_v27 }
 0x347   :  { %v530_v19 = vsel %vm419_vm13, 1.0, %v630_v31 }
 0x348   :  { %v435_v38 = vmul.f32 %v900_v35, %v335_v56  ;;  %v431_v41 = vmul.f32 %v530_v19, %v900_v35 }
 0x34a   :  { %v441_v47 = vsel %vm437_vm12, %v435_v38, 0.0  ;;  %v477_v35 = vsel %vm437_vm12, %v431_v41, 0.0 }
 0x34b   :  { %v323_v51 = vpop.xlane.xlu1 %322 }
 0x34c   :  { %v333_v23 = vsub.f32 %v286_v10, %v323_v51 }
 0x34e   :  { %v433_v5 = vmul.f32 %v524_v36, %v333_v23 }
 0x34f   :  { %v277_v62 = vpop.xlane.xlu1 %276 }
 0x350   :  { %613 = vlog2.f32 %v277_v62  ;;  %v438_v15 = vsel %vm437_vm12, %v433_v5, 0.0 }
 0x353   :  { %v364_v16 = vpop.xlane.xlu1 %363 }
 0x354   :  { %v365_v17 = vcvt.f32.s32 %v364_v16 }
 0x356   :  { %v368_v25 = vadd.s32 %v367_v18, %v365_v17 }
 0x357   :  { %v380_v8 = vpop.xlane.xlu1 %379 }
 0x358   :  { %vm417_vm14 = vcmp.eq.s32.totalorder %v368_v25, %v864_v52  ;;  %v381_v14 = vcvt.f32.s32 %v380_v8  ;;  %v439_v52 = vsel %vm437_vm12, %v434_v29, 0.0 }
 0x359   :  { %v528_v30 = vsel %vm417_vm14, 1.0, %v630_v31  ;;  %v440_v43 = vadd.f32 %v439_v52, %v438_v15 }
 0x35a   :  { %v614_v32 = vpop.eup %613  ;;  %v384_v59 = vadd.s32 %v383_v26, %v381_v14  ;;  %v429_v55 = vmul.f32 %v528_v30, %v524_v36 }
 0x35b   :  { %v285_v3 = vmul.f32 0.6931472, %v614_v32  ;;  %v412_v53 = vpop.xlane.xlu1 %411  ;;  %v442_v48 = vadd.f32 %v441_v47, %v440_v43 }
 0x35c   :  { %vm418_vm15 = vcmp.eq.s32.totalorder %v384_v59, %v767_v0  ;;  %v413_v1 = vcvt.f32.s32 %v412_v53  ;;  %v474_v0 = vsel %vm437_vm12, %v429_v55, 0.0 }
 0x35d   :  { %v529_v4 = vsel %vm418_vm15, 1.0, %v630_v31  ;;  %v289_v21 = vadd.f32 %v285_v3, %v809_v20 }
 0x35e   :  { %v430_v39 = vmul.f32 %v529_v4, %v897_v33  ;;  %v416_v40 = vadd.s32 %v415_v34, %v413_v1 }
 0x35f   :  { %v332_v42 = vpop.xlane.xlu1 %331 }
 0x360   :  { %vm420_vm0 = vcmp.eq.s32.totalorder %v416_v40, %v858_v13  ;;  %v336_v36 = vsub.f32 %v289_v21, %v332_v42  ;;  %v475_v44 = vsel %vm437_vm12, %v430_v39, 0.0 }
 0x361   :  { %v531_v45 = vsel %vm420_vm0, 1.0, %v630_v31  ;;  %v476_v46 = vadd.f32 %v475_v44, %v474_v0 }
 0x362   :  { %v436_v20 = vmul.f32 %v904_v37, %v336_v36  ;;  %v432_v33 = vmul.f32 %v531_v45, %v904_v37 }
 0x363   :  { %v478_v49 = vadd.f32 %v477_v35, %v476_v46  ;;  %v464_v31 = vpop.xlane.xlu1 %463 }
 0x364   :  { %v443_v13 = vsel %vm437_vm12, %v436_v20, 0.0  ;;  %v479_v50 = vsel %vm437_vm12, %v432_v33, 0.0  ;;  %v465_v58 = vrot.slane %v464_v31, 4 }
 0x365   :  { %v444_v51 = vadd.f32 %v443_v13, %v442_v48  ;;  %v480_v57 = vadd.f32 %v479_v50, %v478_v49 }
 0x366   :  { %v466_v60 = vadd.f32 %v465_v58, %v464_v31 }
 0x367   :  { %445 = vadd.xlane.f32.xlu0 %v444_v51 }
 0x368   :  { %v467_v61 = vrot.slane %v466_v60, 2 }
 0x36a   :  { %v468_v37 = vadd.f32 %v467_v61, %v466_v60 }
 0x36b   :  { %481 = vadd.xlane.f32.xlu0 %v480_v57 }
 0x36c   :  { %v469_v12 = vrot.slane %v468_v37, 1 }
 0x36e   :  { %v470_v17 = vadd.f32 %v469_v12, %v468_v37 }
 0x3f4   :  { %v446_v62 = vpop.xlane.xlu0 %445 }
 0x3f5   :  { %v447_v63 = vrot.slane %v446_v62, 4 }
 0x3f7   :  { %v448_v2 = vadd.f32 %v447_v63, %v446_v62 }
 0x3f8   :  { %v482_v6 = vpop.xlane.xlu0 %481 }
 0x3f9   :  { %v449_v7 = vrot.slane %v448_v2, 2  ;;  %v483_v9 = vrot.slane %v482_v6, 4 }
 0x3fb   :  { %v484_v10 = vadd.f32 %v483_v9, %v482_v6  ;;  %v450_v11 = vadd.f32 %v449_v7, %v448_v2 }
 0x3fd   :  { %v485_v16 = vrot.slane %v484_v10, 2  ;;  %v451_v18 = vrot.slane %v450_v11, 1 }
 0x3ff   :  { %v486_v22 = vadd.f32 %v485_v16, %v484_v10  ;;  %v452_v23 = vadd.f32 %v451_v18, %v450_v11 }
 0x401   :  { %548 = vpush %v452_v23  ;;  %v487_v24 = vrot.slane %v486_v22, 1 }
 0x402   :  { %550 = vpush %v470_v17 }
 0x403   :  { %v488_v25 = vadd.f32 %v487_v24, %v486_v22 }
 0x405   :  { %552 = vpush %v488_v25 }
 0x432   :  { %s549_s3 = spop %548 }
 0x433   :  { %455 = sst [smem:[#allocation2]] %s549_s3  ;;  %s551_s12 = spop %550 }
 0x434   :  { %473 = sst [smem:[#allocation2 + $0x1]] %s551_s12 }
 0x436   :  { %s553_s13 = spop %552 }
 0x437   :  { %491 = sst [smem:[#allocation2 + $0x2]] %s553_s13 }
 0x438   :  { %626 = shalt.err (!%p623_p4)
}
 0x439   :  { %s631_s15 = smov [#allocation2]  }
 0x43a   :  { %501 = dma.smem_to_vmem %s631_s15, 16, %s499_s11, [#allocation3]  }
 0x43b   :  { %627 = dma.done.wait [#allocation3], 16  }
 0x43c   :  { %628 = vsyncadd [#allocation3], 4294967280 }
 0x43d   :  { %505 = sfence }
 0x43e   :  { %506 = vsyncpa [#allocation3], 1 }

// kernel: causal_lm_forward.3
= control target key start
LH: loop header
LB: loop body
LE: loop exit
PB: predicated region body
PF: predicated region fallthrough
CT: control target
= control target key end

     0   :  { %s3830_s0 = inlined_call_operand.vmem [shape: s32[2], index: 0, kind: input, shape index: {}]   ;;  %s3831_s1 = inlined_call_operand.vmem [shape: f32[2,16,128], index: 1, kind: input, shape index: {}]   ;;  %s3832_s2 = inlined_call_operand.vmem [shape: f32[16,128], index: 2, kind: input, shape index: {}]   ;;  %s3833_s3 = inlined_call_operand.vmem [shape: f32[16,128], index: 3, kind: input, shape index: {}]   ;;  %s3834_s4 = inlined_call_operand.vmem [shape: f32[128,128], index: 4, kind: input, shape index: {}]   ;;  %s3835_s5 = inlined_call_operand.vmem [shape: f32[1,128], index: 5, kind: input, shape index: {}]   ;;  %s3836_s6 = inlined_call_operand.vmem [shape: bf16[128,384], index: 6, kind: input, shape index: {}]   ;;  %s3837_s7 = inlined_call_operand.vmem [shape: bf16[128,128], index: 7, kind: input, shape index: {}]   ;;  %s3838_s8 = inlined_call_operand.vmem [shape: f32[1,128], index: 8, kind: input, shape index: {}]   ;;  %s3839_s9 = inlined_call_operand.vmem [shape: bf16[128,256], index: 9, kind: input, shape index: {}]   ;;  %s3840_s10 = inlined_call_operand.vmem [shape: bf16[128,256], index: 10, kind: input, shape index: {}]   ;;  %s3841_s11 = inlined_call_operand.vmem [shape: bf16[256,128], index: 11, kind: input, shape index: {}]   ;;  %s3842_s12 = inlined_call_operand.vmem [shape: f32[2,16,128], index: 12, kind: output, shape index: {}]  }
   0x1   :  { %s17_s23 = sshll.u32 %s3830_s0, 4  ;;  %s18_s23 = int_to_ptr.vmem [resolvable:$true] %s17_s23 }
   0x2   :  { %s3219_s24 = scalar_lea.vmem %s18_s23, 16  ;;  %p3224_p1 = scmp.lt.s32.totalorder %s18_s23, %s18_s23 }
   0x3   :  { %p3220_p0 = scmp.ne.s32.totalorder %s18_s23, %s3219_s24  ;;  %p3225_p2 = scmp.lt.s32.totalorder %s3219_s24, %s3219_s24 }
   0x5   :  { %p3226_p3 = por %p3225_p2, %p3224_p1 }
   0x7   :  { %p3227_p4 = pnand %p3226_p3, %p3220_p0 }
   0x9   :  { %3230 = shalt.err (!%p3227_p4)  }
   0xa   :  { %s3241_s25 = smov [#allocation3]  }
   0xb   :  { %20 = dma.vmem_to_smem %s18_s23, 16, %s3241_s25, [#allocation2] }
   0xc   :  { %3235 = dma.done.wait [#allocation2], 16 }
   0xd   :  { %3236 = vsyncadd [#allocation2], 4294967280 }
   0xe   :  { %22 = sfence }
   0xf   :  { %s3316_s26 = smov 0  }
  0x10 LB: > { %s3322_s0 = sadd.s32 4294967295, %s3239_s26   ;;  %p2496_p5 = scmp.ge.s32.totalorder %s3239_s26, 1  ;;  %s3239_s26 = sphi %s3316_s26, %s28_s26  }
  0x11   : > { %p344_p6 = scmp.lt.s32.totalorder %s3239_s26, 3 }
  0x13   : > { %p345_p7 = pnand %p2496_p5, %p344_p6 }
  0x14   : > { %p384_p8 = scmp.lt.s32.totalorder (!%p345_p7), %s3322_s0, 1  ;;  %v3057_v0 = vld [vmem:[%s3836_s6 + $0x4] ss:$12 sps:$4 sm:$0xff] (!%p345_p7)   ;;  %v3242_v1 = vmov (!%p345_p7), 0.0   ;;  %v3059_v2 = vld [vmem:[%s3836_s6] ss:$12 sps:$4 sm:$0xff] (!%p345_p7)  }
  0x15   : > { %348 = sbr.rel (%p345_p7) target bundleno = 3683 (0xe63), region = 64  ;;  %2730 = vmatprep.subr.bf16.mxu1 (!%p345_p7), %v3242_v1  ;;  %582 = vmatprep.subr.bf16.mxu0 (!%p345_p7), %v3057_v0  ;;  %v3060_v3 = vld [vmem:[%s3836_s6 + $0x8] ss:$12 sps:$4 sm:$0xff] (!%p345_p7)   ;;  %v3063_v5 = vld [vmem:[%s3836_s6 + $0x18] ss:$12 sps:$4 sm:$0xff] (!%p345_p7)   ;;  %v3243_v26 = vmov (!%p345_p7), 0  }
  0x16   : > { %583 = vmatpush1.bf16.msra.mxu0 (!%p345_p7), %v3059_v2  ;;  %v3061_v4 = vld [vmem:[%s3836_s6 + $0x1c] ss:$12 sps:$4 sm:$0xff] (!%p345_p7)   ;;  %2731 = vmatpush3.bf16.msra.mxu1 (!%p345_p7), %v3060_v3  ;;  %v3064_v6 = vld [vmem:[%s3836_s6 + $0x20] ss:$12 sps:$4 sm:$0xff] (!%p345_p7)   ;;  %v3068_v13 = vld [vmem:[%s3836_s6 + $0x38] ss:$12 sps:$4 sm:$0xff] (!%p345_p7)  }
  0x17   : > { %584 = vmatprep.subr.bf16.mxu0 (!%p345_p7), %v3061_v4  ;;  %2732 = vmatprep.subr.bf16.mxu1 (!%p345_p7), %v3242_v1  ;;  %v3065_v11 = vld [vmem:[%s3836_s6 + $0x34] ss:$12 sps:$4 sm:$0xff] (!%p345_p7)   ;;  %v3067_v12 = vld [vmem:[%s3836_s6 + $0x30] ss:$12 sps:$4 sm:$0xff] (!%p345_p7)   ;;  %v3069_v14 = vld [vmem:[%s3836_s6 + $0x4c] ss:$12 sps:$4 sm:$0xff] (!%p345_p7)  }
  0x18   : > { %v3071_v15 = vld [vmem:[%s3836_s6 + $0x48] ss:$12 sps:$4 sm:$0xff] (!%p345_p7)   ;;  %v3072_v16 = vld [vmem:[%s3836_s6 + $0x50] ss:$12 sps:$4 sm:$0xff] (!%p345_p7)   ;;  %v3075_v18 = vld [vmem:[%s3836_s6 + $0x60] ss:$12 sps:$4 sm:$0xff] (!%p345_p7)   ;;  %614 = vmatprep.mubr.bf16.mxu0 (!%p345_p7), %v3243_v26 }
  0x19   : > { %v3073_v17 = vld [vmem:[%s3836_s6 + $0x64] ss:$12 sps:$4 sm:$0xff] (!%p345_p7)   ;;  %v3076_v19 = vld [vmem:[%s3836_s6 + $0x68] ss:$12 sps:$4 sm:$0xff] (!%p345_p7)   ;;  %v3080_v22 = vld [vmem:[%s3836_s6 + $0x80] ss:$12 sps:$4 sm:$0xff] (!%p345_p7)  }
  0x1a   : > { %585 = vmatpush1.bf16.msra.mxu0 (!%p345_p7), %v3063_v5  ;;  %2733 = vmatpush3.bf16.msra.mxu1 (!%p345_p7), %v3064_v6  ;;  %v3077_v20 = vld [vmem:[%s3836_s6 + $0x7c] ss:$12 sps:$4 sm:$0xff] (!%p345_p7)   ;;  %v3079_v21 = vld [vmem:[%s3836_s6 + $0x78] ss:$12 sps:$4 sm:$0xff] (!%p345_p7)   ;;  %v3081_v23 = vld [vmem:[%s3836_s6 + $0x94] ss:$12 sps:$4 sm:$0xff] (!%p345_p7)  }
  0x1b   : > { %2734 = vmatprep.subr.bf16.mxu1 (!%p345_p7), %v3242_v1  ;;  %586 = vmatprep.subr.bf16.mxu0 (!%p345_p7), %v3065_v11  ;;  %v3083_v24 = vld [vmem:[%s3836_s6 + $0x90] ss:$12 sps:$4 sm:$0xff] (!%p345_p7)   ;;  %v3084_v25 = vld [vmem:[%s3836_s6 + $0x98] ss:$12 sps:$4 sm:$0xff] (!%p345_p7)   ;;  %vm3244_vm0 = vmmov (!%p345_p7), 0   ;;  %v683_v31 = vld [vmem:[%s3834_s4 + $0x8] sm:$0xff] (!%p345_p7) }
  0x1c   : > { %s3335_s13 = scalar_select %p384_p8, %s3322_s0, 1  ;;  %2746 = vmatprep.mubr.msk.bf16.mxu1 %vm3244_vm0, %v3242_v1  ;;  %v3085_v27 = vld [vmem:[%s3836_s6 + $0xac] ss:$12 sps:$4 sm:$0xff]   ;;  %v3087_v28 = vld [vmem:[%s3836_s6 + $0xa8] ss:$12 sps:$4 sm:$0xff]   ;;  %v682_v30 = vld [vmem:[%s3834_s4] sm:$0xff] }
  0x1d   : > { %v3088_v29 = vld [vmem:[%s3836_s6 + $0xb0] ss:$12 sps:$4 sm:$0xff]   ;;  %v2908_v32 = vpack.c.bf16 %v683_v31, %v682_v30  ;;  %v2501_v42 = vld [vmem:[%s3835_s5] ss:$0 sm:$0xff]  ;;  %v687_v51 = vld [vmem:[%s3834_s4 + $0x28] sm:$0xff]  ;;  %vm860_vm1 = vcmask 261120  }
  0x1e   : > { %s2617_s20 = sshll.u32 %s3335_s13, 4  ;;  %587 = vmatpush1.bf16.msra.mxu0 %v3067_v12  ;;  %2735 = vmatpush3.bf16.msra.mxu1 %v3068_v13  ;;  %v684_v44 = vld [vmem:[%s3834_s4 + $0x10] sm:$0xff]  ;;  %v685_v45 = vld [vmem:[%s3834_s4 + $0x18] sm:$0xff]  ;;  %v686_v50 = vld [vmem:[%s3834_s4 + $0x20] sm:$0xff]  ;;  %s3245_s18 = smov 96   ;;  %vm952_vm7 = vcmask 130048  }
  0x1f   : > { %s3355_s25 = scalar_lea.vmem %s3831_s1, %s2617_s20  ;;  %2736 = vmatprep.subr.bf16.mxu1 %v3242_v1  ;;  %588 = vmatprep.subr.bf16.mxu0 %v3069_v14  ;;  %v2912_v49 = vpack.c.bf16 %v685_v45, %v684_v44  ;;  %v2916_v52 = vpack.c.bf16 %v687_v51, %v686_v50  ;;  %v688_v53 = vld [vmem:[%s3834_s4 + $0x30] sm:$0xff]  ;;  %v689_v54 = vld [vmem:[%s3834_s4 + $0x38] sm:$0xff]  ;;  %v690_v56 = vld [vmem:[%s3834_s4 + $0x40] sm:$0xff]  ;;  %v667_v45 = vlaneseq  ;;  %s666_s19 = sld [smem:[#allocation3 + %s3322_s0]] }
  0x20   : > { %v3359_v7 = vld [vmem:[%s3355_s25] sm:$0xff]  ;;  %v3362_v8 = vld [vmem:[%s3355_s25 + $0x8] sm:$0xff]  ;;  %v2920_v55 = vpack.c.bf16 %v689_v54, %v688_v53  ;;  %v692_v59 = vld [vmem:[%s3834_s4 + $0x50] sm:$0xff]  ;;  %s3246_s0 = smov 64   ;;  %s3247_s14 = smov 32  }
  0x21   : > { %v397_v9 = vmul.f32 %v3359_v7, %v3359_v7  ;;  %v398_v10 = vmul.f32 %v3362_v8, %v3362_v8  ;;  %v691_v57 = vld [vmem:[%s3834_s4 + $0x48] sm:$0xff]  ;;  %v693_v60 = vld [vmem:[%s3834_s4 + $0x58] sm:$0xff]  ;;  %v694_v62 = vld [vmem:[%s3834_s4 + $0x60] sm:$0xff]  ;;  %s393_s30 = scalar_lea.vmem %s3842_s12, %s2617_s20 }
  0x22   : > { %589 = vmatpush1.bf16.msra.mxu0 %v3071_v15  ;;  %2737 = vmatpush3.bf16.msra.mxu1 %v3072_v16  ;;  %v2924_v58 = vpack.c.bf16 %v691_v57, %v690_v56  ;;  %v2928_v61 = vpack.c.bf16 %v693_v60, %v692_v59  ;;  %v695_v63 = vld [vmem:[%s3834_s4 + $0x68] sm:$0xff]  ;;  %v696_v2 = vld [vmem:[%s3834_s4 + $0x70] sm:$0xff]  ;;  %v697_v3 = vld [vmem:[%s3834_s4 + $0x78] sm:$0xff] }
  0x23   : > { %399 = vadd.xlane.f32.xlu0 %v397_v9  ;;  %2738 = vmatprep.subr.bf16.mxu1 %v3242_v1  ;;  %v2932_v0 = vpack.c.bf16 %v695_v63, %v694_v62  ;;  %v2936_v4 = vpack.c.bf16 %v697_v3, %v696_v2  ;;  %v679_v15 = vld [vmem:[%s3832_s2 + $0x8] sm:$0xff]  ;;  %vm3508_vm2 = vmpackc.low %vm860_vm1, %vm860_vm1 }
  0x24   : > { %590 = vmatprep.subr.bf16.mxu0 %v3073_v17  ;;  %v681_v16 = vld [vmem:[%s3833_s3 + $0x8] sm:$0xff]  ;;  %v678_v17 = vld [vmem:[%s3832_s2] sm:$0xff] }
  0x26   : > { %591 = vmatpush1.bf16.msra.mxu0 %v3075_v18  ;;  %2739 = vmatpush3.bf16.msra.mxu1 %v3076_v19  ;;  %v680_v18 = vld [vmem:[%s3833_s3] sm:$0xff] }
  0x27   : > { %401 = vadd.xlane.f32.xlu0 %v398_v10  ;;  %592 = vmatprep.subr.bf16.mxu0 %v3077_v20 }
  0x28   : > { %2740 = vmatprep.subr.bf16.mxu1 %v3242_v1 }
  0x2a   : > { %593 = vmatpush1.bf16.msra.mxu0 %v3079_v21  ;;  %2741 = vmatpush3.bf16.msra.mxu1 %v3080_v22 }
  0x2b   : > { %594 = vmatprep.subr.bf16.mxu0 %v3081_v23  ;;  %2742 = vmatprep.subr.bf16.mxu1 %v3242_v1 }
  0x2e   : > { %595 = vmatpush1.bf16.msra.mxu0 %v3083_v24  ;;  %2743 = vmatpush3.bf16.msra.mxu1 %v3084_v25 }
  0x2f   : > { %596 = vmatprep.subr.bf16.mxu0 %v3085_v27  ;;  %2744 = vmatprep.subr.bf16.mxu1 %v3242_v1 }
  0x32   : > { %597 = vmatpush1.bf16.msra.mxu0 %v3087_v28  ;;  %2745 = vmatpush3.bf16.msra.mxu1 %v3088_v29 }
  0x33   : > { %2909 = vmatprep.subr.bf16.mxu0 %v2908_v32  ;;  %2941 = vmatprep.subr.bf16.mxu1 %v2908_v32 }
  0xb0   : > { %v400_v33 = vpop.xlane.xlu0 %399 }
  0xb1   : > { %v404_v34 = vmul.f32 0.0078125, %v400_v33 }
  0xb3   : > { %v406_v35 = vadd.f32 1e-06, %v404_v34 }
  0xb4   : > { %v402_v36 = vpop.xlane.xlu0 %401 }
  0xb5   : > { %3161 = vrsqrt.f32 %v406_v35  ;;  %v405_v37 = vmul.f32 0.0078125, %v402_v36 }
  0xb7   : > { %v407_v38 = vadd.f32 1e-06, %v405_v37 }
  0xb9   : > { %3163 = vrsqrt.f32 %v407_v38 }
  0xbf   : > { %v3162_v39 = vpop.eup %3161 }
  0xc0   : > { %v410_v40 = vmul.f32 %v3162_v39, %v3359_v7 }
  0xc2   : > { %v419_v46 = vmul.f32 %v2501_v42, %v410_v40 }
  0xc3   : > { %v3164_v41 = vpop.eup %3163 }
  0xc4   : > { %v411_v43 = vmul.f32 %v3164_v41, %v3362_v8 }
  0xc6   : > { %v420_v47 = vmul.f32 %v2501_v42, %v411_v43 }
  0xc8   : > { %v421_v48 = vpack.c.bf16 %v420_v47, %v419_v46  ;;  %v668_v46 = vshrl.u32 %v667_v45, 7 }
  0xca   : > { %615 = vmatmul.mubr.bf16.vlgmr.msra.gmra.mrb[0].mxu0 %v421_v48  ;;  %2747 = vmatmul.mubr.bf16.vlgmr.msra.gmra.mrb[0].mxu1 %v421_v48  ;;  %v669_v47 = vadd.s32 8, %v668_v46  ;;  %v671_v48 = vand.u32 127, %v667_v45 }
  0xcb   : > { %2911 = vmatpush3.bf16.msra.mxu0 %v2908_v32  ;;  %2943 = vmatpush3.bf16.msra.mxu1 %v2908_v32 }
  0xcc   : > { %2913 = vmatprep.subr.bf16.mxu0 %v2912_v49  ;;  %2945 = vmatprep.subr.bf16.mxu1 %v2912_v49  ;;  %vm673_vm3 = vcmp.le.s32.totalorder %v671_v48, %v669_v47  ;;  %vm672_vm5 = vcmp.le.s32.totalorder %v671_v48, %v668_v46 }
  0xcf   : > { %2915 = vmatpush3.bf16.msra.mxu0 %v2912_v49  ;;  %2947 = vmatpush3.bf16.msra.mxu1 %v2912_v49  ;;  %v674_v49 = vstv %s666_s19 }
  0xd0   : > { %2917 = vmatprep.subr.bf16.mxu0 %v2916_v52  ;;  %2949 = vmatprep.subr.bf16.mxu1 %v2916_v52  ;;  %vm675_vm4 = vcmp.lt.s32.totalorder %v671_v48, %v674_v49 }
  0xd1   : > { %vm3531_vm6 = vmand %vm673_vm3, %vm675_vm4 }
  0xd2   : > { %vm3535_vm8 = vmand %vm672_vm5, %vm675_vm4 }
  0xd3   : > { %2919 = vmatpush3.bf16.msra.mxu0 %v2916_v52  ;;  %2951 = vmatpush3.bf16.msra.mxu1 %v2916_v52 }
  0xd4   : > { %2921 = vmatprep.subr.bf16.mxu0 %v2920_v55  ;;  %2953 = vmatprep.subr.bf16.mxu1 %v2920_v55 }
  0xd7   : > { %2923 = vmatpush3.bf16.msra.mxu0 %v2920_v55  ;;  %2955 = vmatpush3.bf16.msra.mxu1 %v2920_v55 }
  0xd8   : > { %2925 = vmatprep.subr.bf16.mxu0 %v2924_v58  ;;  %2957 = vmatprep.subr.bf16.mxu1 %v2924_v58 }
  0xdb   : > { %2927 = vmatpush3.bf16.msra.mxu0 %v2924_v58  ;;  %2959 = vmatpush3.bf16.msra.mxu1 %v2924_v58 }
  0xdc   : > { %2929 = vmatprep.subr.bf16.mxu0 %v2928_v61  ;;  %2961 = vmatprep.subr.bf16.mxu1 %v2928_v61 }
  0xdf   : > { %2931 = vmatpush3.bf16.msra.mxu0 %v2928_v61  ;;  %2963 = vmatpush3.bf16.msra.mxu1 %v2928_v61 }
  0xe0   : > { %2933 = vmatprep.subr.bf16.mxu0 %v2932_v0  ;;  %2965 = vmatprep.subr.bf16.mxu1 %v2932_v0 }
  0xe3   : > { %2935 = vmatpush3.bf16.msra.mxu0 %v2932_v0  ;;  %2967 = vmatpush3.bf16.msra.mxu1 %v2932_v0 }
  0xe4   : > { %2937 = vmatprep.subr.bf16.mxu0 %v2936_v4  ;;  %2969 = vmatprep.subr.bf16.mxu1 %v2936_v4 }
  0xe7   : > { %2939 = vmatpush3.bf16.msra.mxu0 %v2936_v4  ;;  %2971 = vmatpush3.bf16.msra.mxu1 %v2936_v4 }
 0x19d   : > { %v616_v5 = vpop.f32.mrb[0].mxu0  ;;  %v659_v6 = vpop.f32.mrb[0].mxu1 }
 0x19e   : > { %v618_v7 = vpop.f32.mrb[1].mxu0  ;;  %v2748_v8 = vpop.f32.mrb[1].mxu1  ;;  %2782 = vmatprep.mubr.f32.mxu0 %v616_v5  ;;  %v698_v24 = vmul.f32 %v678_v17, %v616_v5 }
 0x19f   : > { %v620_v9 = vpop.f32.mrb[2].mxu0  ;;  %v662_v10 = vpop.f32.mrb[2].mxu1  ;;  %2817 = vmatprep.mubr.f32.mxu1 %v618_v7  ;;  %v779_v30 = vmul.f32 %v678_v17, %v618_v7 }
 0x1a0   : > { %v622_v11 = vpop.f32.mrb[3].mxu0  ;;  %v2749_v12 = vpop.f32.mrb[3].mxu1  ;;  %2783 = vmatmul.mubr.f32.vlgmr.msra.gmra.mrb[4].mxu0 %v620_v9  ;;  %v2978_v13 = vpack.c.bf16 %v662_v10, %v659_v6  ;;  %v3484_v14 = vpack.i.bf16 %v662_v10, %v659_v6  ;;  %v699_v20 = vmul.f32 %v679_v15, %v620_v9 }
 0x1a1   : > { %2818 = vmatmul.mubr.f32.vlgmr.msra.gmra.mrb[4].mxu1 %v622_v11  ;;  %v780_v25 = vmul.f32 %v679_v15, %v622_v11 }
 0x273   : > { %v2784_v19 = vpop.f32.mrb[4].mxu0 }
 0x274   : > { %v776_v21 = vmul.f32 %v2784_v19, %v681_v16  ;;  %v766_v22 = vpop.f32.mrb[5].mxu0  ;;  %v2819_v23 = vpop.f32.mrb[4].mxu1 }
 0x275   : > { %v775_v27 = vmul.f32 %v766_v22, %v680_v18  ;;  %v857_v28 = vmul.f32 %v2819_v23, %v681_v16  ;;  %v847_v29 = vpop.f32.mrb[5].mxu1 }
 0x276   : > { %v3498_v31 = vadd.f32 %v776_v21, %v699_v20  ;;  %v856_v32 = vmul.f32 %v847_v29, %v680_v18 }
 0x277   : > { %v3500_v33 = vadd.f32 %v775_v27, %v698_v24  ;;  %v859_v34 = vadd.f32 %v857_v28, %v780_v25 }
 0x278   : > { %v858_v35 = vadd.f32 %v856_v32, %v779_v30  ;;  %1065 = vrot.lane.b32.xlu0 %v3498_v31, %s3245_s18 }
 0x279   : > { %2824 = vmatprep.mubr.msk.f32.mxu0 %vm860_vm1, %v3500_v33 }
 0x27a   : > { %v3512_v37 = vpack.i.bf16 %v859_v34, %v858_v35  ;;  %v2972_v38 = vpack.c.bf16 %v859_v34, %v858_v35 }
 0x27c   : > { %3028 = vrot.lane.b32.xlu1 %v3512_v37, %s3245_s18  ;;  %2974 = vmatprep.subr.msk.bf16.mxu0 %vm3508_vm2, %v2972_v38 }
 0x27d   : > { %2977 = vmatpush3.bf16.xpose.msk.msra.mxu0 %vm3508_vm2, %v2972_v38 }
 0x27e   : > { %2979 = vmatprep.subr.bf16.mxu0 %v2978_v13 }
 0x280   : > { %1063 = vrot.lane.b32.xlu1 %v3500_v33, %s3245_s18 }
 0x284   : > { %2825 = vmatmul.mubr.msk.f32.vlgmr.msra.gmra.mrb[6].mxu0 %vm860_vm1, %v3498_v31 }
 0x285   : > { %2981 = vmatpush3.bf16.msra.mxu0 %v2978_v13 }
 0x2ea   : > { %v1066_v44 = vpop.permute.xlu0 %1065 }
 0x2ee   : > { %v3029_v39 = vpop.permute.xlu1 %3028 }
 0x2ef   : > { %v3031_v40 = vunpack.i.h.bf16 %v3029_v39  ;;  %v3030_v41 = vunpack.i.l.bf16 %v3029_v39 }
 0x2f1   : > { %v2982_v42 = vpack.c.bf16 %v3031_v40, %v3030_v41 }
 0x2f2   : > { %v1064_v43 = vpop.permute.xlu1 %1063 }
 0x2f3   : > { %2984 = vmatprep.subr.msk.bf16.mxu1 %vm3508_vm2, %v2982_v42  ;;  %2838 = vmatprep.mubr.msk.f32.mxu1 %vm860_vm1, %v1064_v43 }
 0x2f4   : > { %2987 = vmatpush3.bf16.xpose.msk.msra.mxu1 %vm3508_vm2, %v2982_v42 }
 0x2fb   : > { %2839 = vmatmul.mubr.msk.f32.vlgmr.msra.gmra.mrb[6].mxu1 %vm860_vm1, %v1066_v44 }
 0x357   : > { %v2826_v50 = vpop.f32.mrb[6].mxu0 }
 0x358   : > { %v949_v52 = vmul.f32 0.17677669, %v2826_v50  ;;  %v939_v53 = vpop.f32.mrb[7].mxu0  ;;  %v3089_v50 = vld [vmem:[%s3837_s7 + $0x10] sm:$0xff]  }
 0x359   : > { %v948_v55 = vmul.f32 0.17677669, %v939_v53  ;;  %v3090_v53 = vld [vmem:[%s3837_s7 + $0x18] sm:$0xff]  }
 0x35a   : > { %v951_v56 = vsel %vm3531_vm6, %v949_v52, -1e+30 }
 0x35b   : > { %v956_v57 = vsel %vm952_vm7, %v951_v56, -inf  ;;  %v950_v58 = vsel %vm3535_vm8, %v948_v55, -1e+30 }
 0x35c   : > { %957 = vmax.xlane.f32.xlu0 %v956_v57  ;;  %v953_v59 = vsel %vm952_vm7, %v950_v58, -inf }
 0x35d   : > { %954 = vmax.xlane.f32.xlu1 %v953_v59 }
 0x3ce   : > { %v2840_v60 = vpop.f32.mrb[6].mxu1 }
 0x3cf   : > { %v1145_v61 = vpop.f32.mrb[7].mxu1  ;;  %v1155_v62 = vmul.f32 0.17677669, %v2840_v60 }
 0x3d0   : > { %v1154_v63 = vmul.f32 0.17677669, %v1145_v61  ;;  %v3091_v61 = vld [vmem:[%s3837_s7] sm:$0xff]  }
 0x3d1   : > { %v1157_v3 = vsel %vm3531_vm6, %v1155_v62, -1e+30 }
 0x3d2   : > { %v1156_v0 = vsel %vm3535_vm8, %v1154_v63, -1e+30  ;;  %v1161_v4 = vsel %vm952_vm7, %v1157_v3, -inf }
 0x3d3   : > { %v1158_v2 = vsel %vm952_vm7, %v1156_v0, -inf }
 0x3d4   : > { %1159 = vmax.xlane.f32.xlu1 %v1158_v2  ;;  %v3092_v2 = vld [vmem:[%s3837_s7 + $0x8] sm:$0xff]  }
 0x3d8   : > { %1162 = vmax.xlane.f32.xlu1 %v1161_v4 }
 0x3e9   : > { %v958_v5 = vpop.xlane.xlu0 %957 }
 0x3ea   : > { %v960_v6 = vsub.f32 %v951_v56, %v958_v5  ;;  %v955_v7 = vpop.xlane.xlu1 %954 }
 0x3eb   : > { %v959_v8 = vsub.f32 %v950_v58, %v955_v7 }
 0x3ec   : > { %v963_v9 = vmul.f32 1.442695, %v960_v6 }
 0x3ed   : > { %v961_v10 = vmul.f32 1.442695, %v959_v8 }
 0x3ee   : > { %3165 = vpow2.f32 %v963_v9 }
 0x3ef   : > { %3167 = vpow2.f32 %v961_v10 }
 0x3f8   : > { %v3166_v11 = vpop.eup %3165 }
 0x3f9   : > { %v968_v12 = vsel %vm952_vm7, %v3166_v11, 0.0  ;;  %v3168_v13 = vpop.eup %3167 }
 0x3fa   : > { %969 = vadd.xlane.f32.xlu1 %v968_v12  ;;  %v965_v15 = vsel %vm952_vm7, %v3168_v13, 0.0 }
 0x3fe   : > { %966 = vadd.xlane.f32.xlu1 %v965_v15 }
 0x461   : > { %v1160_v16 = vpop.xlane.xlu1 %1159 }
 0x462   : > { %v1164_v17 = vsub.f32 %v1156_v0, %v1160_v16 }
 0x464   : > { %v1166_v18 = vmul.f32 1.442695, %v1164_v17 }
 0x465   : > { %v1163_v19 = vpop.xlane.xlu1 %1162 }
 0x466   : > { %3169 = vpow2.f32 %v1166_v18  ;;  %v1165_v20 = vsub.f32 %v1157_v3, %v1163_v19 }
 0x468   : > { %v1168_v21 = vmul.f32 1.442695, %v1165_v20 }
 0x46a   : > { %3171 = vpow2.f32 %v1168_v21 }
 0x470   : > { %v3170_v22 = vpop.eup %3169 }
 0x471   : > { %v1170_v23 = vsel %vm952_vm7, %v3170_v22, 0.0 }
 0x472   : > { %1171 = vadd.xlane.f32.xlu1 %v1170_v23 }
 0x474   : > { %v3172_v24 = vpop.eup %3171 }
 0x475   : > { %v1173_v25 = vsel %vm952_vm7, %v3172_v24, 0.0 }
 0x476   : > { %1174 = vadd.xlane.f32.xlu0 %v1173_v25 }
 0x483   : > { %3033 = vrot.lane.b32.xlu1 %v3484_v14, %s3245_s18 }
 0x487   : > { %1388 = vrot.lane.b32.xlu1 %v3500_v33, %s3246_s0  ;;  %v970_v27 = vpop.xlane.xlu1 %969 }
 0x488   : > { %v972_v28 = vmax.f32 %v970_v27, 1e-30 }
 0x48a   : > { %3173 = vrcp.f32 %v972_v28 }
 0x48b   : > { %1390 = vrot.lane.b32.xlu1 %v3498_v31, %s3246_s0  ;;  %v967_v29 = vpop.xlane.xlu1 %966 }
 0x48c   : > { %v971_v30 = vmax.f32 %v967_v29, 1e-30  ;;  %3038 = vrot.lane.b32.xlu0 %v3512_v37, %s3246_s0 }
 0x48e   : > { %3175 = vrcp.f32 %v971_v30 }
 0x494   : > { %v3174_v32 = vpop.eup %3173 }
 0x495   : > { %v976_v38 = vmul.f32 %v3174_v32, %v3166_v11 }
 0x498   : > { %v3176_v34 = vpop.eup %3175 }
 0x499   : > { %v975_v35 = vmul.f32 %v3176_v34, %v3168_v13 }
 0x49b   : > { %2831 = vmatprep.mubr.msk.f32.mxu0 %vm952_vm7, %v975_v35 }
 0x49c   : > { %2832 = vmatmul.mubr.msk.f32.vlgmr.msra.gmra.mrb[8].mxu0 %vm952_vm7, %v976_v38 }
 0x4ff   : > { %v1172_v39 = vpop.xlane.xlu1 %1171 }
 0x500   : > { %v1176_v40 = vmax.f32 %v1172_v39, 1e-30 }
 0x502   : > { %3177 = vrcp.f32 %v1176_v40 }
 0x503   : > { %v1175_v41 = vpop.xlane.xlu0 %1174  ;;  %v3034_v42 = vpop.permute.xlu1 %3033 }
 0x504   : > { %v1177_v43 = vmax.f32 %v1175_v41, 1e-30  ;;  %v3036_v44 = vunpack.i.h.bf16 %v3034_v42  ;;  %v3035_v45 = vunpack.i.l.bf16 %v3034_v42  ;;  %v3093_v42 = vld [vmem:[%s3837_s7 + $0x20] sm:$0xff]  }
 0x506   : > { %3179 = vrcp.f32 %v1177_v43  ;;  %v2988_v46 = vpack.c.bf16 %v3036_v44, %v3035_v45 }
 0x507   : > { %v3039_v59 = vpop.permute.xlu0 %3038  ;;  %v1389_v4 = vpop.permute.xlu1 %1388 }
 0x508   : > { %2989 = vmatprep.subr.bf16.mxu0 %v2988_v46  ;;  %v3041_v63 = vunpack.i.h.bf16 %v3039_v59  ;;  %v3040_v0 = vunpack.i.l.bf16 %v3039_v59 }
 0x509   : > { %2991 = vmatpush3.bf16.msra.mxu0 %v2988_v46 }
 0x50a   : > { %2848 = vmatprep.subr.bf16.mxu0 %v3242_v1  ;;  %v2992_v3 = vpack.c.bf16 %v3041_v63, %v3040_v0 }
 0x50b   : > { %v1391_v5 = vpop.permute.xlu1 %1390 }
 0x50c   : > { %v3178_v47 = vpop.eup %3177 }
 0x50d   : > { %v1180_v48 = vmul.f32 %v3178_v47, %v3170_v22 }
 0x50f   : > { %2845 = vmatprep.mubr.msk.f32.mxu0 %vm952_vm7, %v1180_v48 }
 0x510   : > { %v3180_v49 = vpop.eup %3179 }
 0x511   : > { %v1181_v52 = vmul.f32 %v3180_v49, %v3172_v24 }
 0x513   : > { %2846 = vmatmul.mubr.msk.f32.vlgmr.msra.gmra.mrb[10].mxu0 %vm952_vm7, %v1181_v52 }
 0x514   : > { %2849 = vmatpush3.bf16.msra.mxu0 %v3089_v50  ;;  %2852 = vmatprep.mubr.msk.bf16.mxu0 %vm3244_vm0, %v3242_v1 }
 0x515   : > { %2850 = vmatprep.subr.bf16.mxu0 %v3242_v1 }
 0x518   : > { %2851 = vmatpush3.bf16.msra.mxu0 %v3090_v53 }
 0x519   : > { %2856 = vmatprep.subr.bf16.mxu0 %v3242_v1 }
 0x56f   : > { %v2833_v55 = vpop.f32.mrb[8].mxu0 }
 0x570   : > { %v1049_v56 = vpop.f32.mrb[9].mxu0 }
 0x571   : > { %v1058_v57 = vpack.c.bf16 %v2833_v55, %v1049_v56 }
 0x5e6   : > { %v2847_v58 = vpop.f32.mrb[10].mxu0 }
 0x5e7   : > { %v1262_v60 = vpop.f32.mrb[11].mxu0 }
 0x5e8   : > { %v1271_v62 = vpack.c.bf16 %v2847_v58, %v1262_v60  ;;  %v3094_v58 = vld [vmem:[%s3837_s7 + $0x28] sm:$0xff]  }
 0x5ea   : > { %2853 = vmatmul.mubr.msk.bf16.vlgmr.msra.gmra.mrb[12].mxu0 %vm860_vm1, %v1271_v62 }
 0x5eb   : > { %2857 = vmatpush3.bf16.msra.mxu0 %v3091_v61  ;;  %2860 = vmatprep.mubr.msk.bf16.mxu0 %vm3244_vm0, %v3242_v1 }
 0x5ec   : > { %2858 = vmatprep.subr.bf16.mxu0 %v3242_v1 }
 0x5ef   : > { %2859 = vmatpush3.bf16.msra.mxu0 %v3092_v2 }
 0x5f0   : > { %2994 = vmatprep.subr.msk.bf16.mxu0 %vm3508_vm2, %v2992_v3 }
 0x5f2   : > { %2861 = vmatmul.mubr.msk.bf16.vlgmr.msra.gmra.mrb[16].mxu0 %vm860_vm1, %v1058_v57 }
 0x5f3   : > { %2868 = vmatprep.mubr.msk.f32.mxu0 %vm860_vm1, %v1389_v4 }
 0x5f8   : > { %2997 = vmatpush3.bf16.xpose.msk.msra.mxu0 %vm3508_vm2, %v2992_v3 }
 0x5f9   : > { %2878 = vmatprep.subr.bf16.mxu0 %v3242_v1 }
 0x5ff   : > { %2869 = vmatmul.mubr.msk.f32.vlgmr.msra.gmra.mrb[20].mxu0 %vm860_vm1, %v1391_v5 }
 0x600   : > { %2882 = vmatprep.mubr.msk.bf16.mxu0 %vm3244_vm0, %v3242_v1  ;;  %2879 = vmatpush3.bf16.msra.mxu0 %v3093_v42  ;;  %v3102_v42 = vld [vmem:[%s3840_s10 + $0x4] ss:$8 sps:$4 sm:$0xff]  }
 0x601   : > { %2880 = vmatprep.subr.bf16.mxu0 %v3242_v1 }
 0x604   : > { %2881 = vmatpush3.bf16.msra.mxu0 %v3094_v58 }
 0x605   : > { %2900 = vmatprep.subr.bf16.mxu0 %v3242_v1 }
 0x6bd   : > { %v1325_v6 = vpop.f32.mrb[12].mxu0 }
 0x6be   : > { %v2854_v7 = vpop.f32.mrb[13].mxu0 }
 0x6bf   : > { %v1328_v8 = vpop.f32.mrb[14].mxu0 }
 0x6c0   : > { %v2855_v9 = vpop.f32.mrb[15].mxu0 }
 0x6c5   : > { %v1381_v10 = vpop.f32.mrb[16].mxu0 }
 0x6c6   : > { %v3598_v11 = vadd.f32 %v1381_v10, %v1325_v6  ;;  %v2862_v12 = vpop.f32.mrb[17].mxu0 }
 0x6c7   : > { %v1384_v13 = vpop.f32.mrb[18].mxu0 }
 0x6c8   : > { %v3600_v15 = vadd.f32 %v1384_v13, %v1328_v8  ;;  %v2863_v16 = vpop.f32.mrb[19].mxu0 }
 0x6d2   : > { %v2870_v17 = vpop.f32.mrb[20].mxu0 }
 0x6d3   : > { %v1480_v18 = vmul.f32 0.17677669, %v2870_v17  ;;  %v1470_v19 = vpop.f32.mrb[21].mxu0 }
 0x6d4   : > { %v1479_v20 = vmul.f32 0.17677669, %v1470_v19 }
 0x6d5   : > { %v1482_v21 = vsel %vm3531_vm6, %v1480_v18, -1e+30 }
 0x6d6   : > { %v1486_v22 = vsel %vm952_vm7, %v1482_v21, -inf  ;;  %v1481_v23 = vsel %vm3535_vm8, %v1479_v20, -1e+30  ;;  %v3095_v20 = vld [vmem:[%s3837_s7 + $0x30] sm:$0xff]  }
 0x6d7   : > { %1487 = vmax.xlane.f32.xlu1 %v1486_v22  ;;  %v1483_v24 = vsel %vm952_vm7, %v1481_v23, -inf }
 0x6d8   : > { %1484 = vmax.xlane.f32.xlu0 %v1483_v24 }
 0x6e8   : > { %3043 = vrot.lane.b32.xlu1 %v3484_v14, %s3246_s0 }
 0x6ec   : > { %1657 = vrot.lane.b32.xlu1 %v3500_v33, %s3247_s14 }
 0x6f0   : > { %1659 = vrot.lane.b32.xlu1 %v3498_v31, %s3247_s14 }
 0x764   : > { %v1488_v25 = vpop.xlane.xlu1 %1487 }
 0x765   : > { %v1490_v27 = vsub.f32 %v1482_v21, %v1488_v25  ;;  %v1485_v28 = vpop.xlane.xlu0 %1484 }
 0x766   : > { %v1489_v29 = vsub.f32 %v1481_v23, %v1485_v28 }
 0x767   : > { %v1493_v30 = vmul.f32 1.442695, %v1490_v27 }
 0x768   : > { %v1491_v32 = vmul.f32 1.442695, %v1489_v29  ;;  %v3044_v34 = vpop.permute.xlu1 %3043 }
 0x769   : > { %3181 = vpow2.f32 %v1493_v30  ;;  %v3046_v35 = vunpack.i.h.bf16 %v3044_v34  ;;  %v3045_v38 = vunpack.i.l.bf16 %v3044_v34 }
 0x76a   : > { %3183 = vpow2.f32 %v1491_v32 }
 0x76b   : > { %v2998_v39 = vpack.c.bf16 %v3046_v35, %v3045_v38 }
 0x76c   : > { %v1658_v56 = vpop.permute.xlu1 %1657 }
 0x76d   : > { %2999 = vmatprep.subr.bf16.mxu1 %v2998_v39 }
 0x76e   : > { %3001 = vmatpush3.bf16.msra.mxu1 %v2998_v39 }
 0x770   : > { %v1660_v57 = vpop.permute.xlu1 %1659 }
 0x773   : > { %v3182_v40 = vpop.eup %3181 }
 0x774   : > { %v1498_v33 = vsel %vm952_vm7, %v3182_v40, 0.0  ;;  %v3184_v41 = vpop.eup %3183 }
 0x775   : > { %1499 = vadd.xlane.f32.xlu0 %v1498_v33  ;;  %v1495_v31 = vsel %vm952_vm7, %v3184_v41, 0.0  ;;  %v3097_v33 = vld [vmem:[%s3839_s9] ss:$8 sps:$4 sm:$0xff]  }
 0x779   : > { %1496 = vadd.xlane.f32.xlu0 %v1495_v31  ;;  %v3100_v31 = vld [vmem:[%s3840_s10] ss:$8 sps:$4 sm:$0xff]  }
 0x78f   : > { %3048 = vrot.lane.b32.xlu0 %v3512_v37, %s3247_s14 }
 0x802   : > { %v1500_v43 = vpop.xlane.xlu0 %1499 }
 0x803   : > { %v1502_v44 = vmax.f32 %v1500_v43, 1e-30  ;;  %v3108_v43 = vld [vmem:[%s3840_s10 + $0x14] ss:$8 sps:$4 sm:$0xff]  }
 0x805   : > { %3185 = vrcp.f32 %v1502_v44  ;;  %v3103_v44 = vld [vmem:[%s3839_s9 + $0x10] ss:$8 sps:$4 sm:$0xff]  }
 0x806   : > { %v1497_v45 = vpop.xlane.xlu0 %1496 }
 0x807   : > { %v1501_v46 = vmax.f32 %v1497_v45, 1e-30  ;;  %v3106_v45 = vld [vmem:[%s3840_s10 + $0x10] ss:$8 sps:$4 sm:$0xff]  }
 0x809   : > { %3187 = vrcp.f32 %v1501_v46 }
 0x80a   : > { %v3049_v47 = vpop.permute.xlu0 %3048 }
 0x80b   : > { %v3051_v48 = vunpack.i.h.bf16 %v3049_v47  ;;  %v3050_v49 = vunpack.i.l.bf16 %v3049_v47 }
 0x80d   : > { %v3002_v50 = vpack.c.bf16 %v3051_v48, %v3050_v49 }
 0x80f   : > { %3004 = vmatprep.subr.msk.bf16.mxu1 %vm3508_vm2, %v3002_v50  ;;  %v3186_v37 = vpop.eup %3185 }
 0x810   : > { %v1506_v55 = vmul.f32 %v3186_v37, %v3182_v40 }
 0x813   : > { %v3188_v52 = vpop.eup %3187 }
 0x814   : > { %v1505_v53 = vmul.f32 %v3188_v52, %v3184_v41  ;;  %v3099_v41 = vld [vmem:[%s3839_s9 + $0x4] ss:$8 sps:$4 sm:$0xff]  }
 0x816   : > { %2875 = vmatprep.mubr.msk.f32.mxu1 %vm952_vm7, %v1505_v53 }
 0x817   : > { %2876 = vmatmul.mubr.msk.f32.vlgmr.msra.gmra.mrb[8].mxu1 %vm952_vm7, %v1506_v55  ;;  %v3218_v55 = vld [vmem:[%s3355_s25 + $0x8] sm:$0xff] }
 0x818   : > { %3007 = vmatpush3.bf16.xpose.msk.msra.mxu1 %vm3508_vm2, %v3002_v50  ;;  %2890 = vmatprep.mubr.msk.f32.mxu1 %vm860_vm1, %v1658_v56  ;;  %v3217_v50 = vld [vmem:[%s3355_s25] sm:$0xff] }
 0x81f   : > { %2891 = vmatmul.mubr.msk.f32.vlgmr.msra.gmra.mrb[10].mxu1 %vm860_vm1, %v1660_v57 }
 0x8ea   : > { %v2877_v59 = vpop.f32.mrb[8].mxu1 }
 0x8eb   : > { %v1585_v60 = vpop.f32.mrb[9].mxu1 }
 0x8ec   : > { %v1594_v61 = vpack.c.bf16 %v2877_v59, %v1585_v60  ;;  %v3111_v59 = vld [vmem:[%s3839_s9 + $0x24] ss:$8 sps:$4 sm:$0xff]  }
 0x8ed   : > { %v3114_v60 = vld [vmem:[%s3840_s10 + $0x24] ss:$8 sps:$4 sm:$0xff]  }
 0x8ee   : > { %2883 = vmatmul.mubr.msk.bf16.vlgmr.msra.gmra.mrb[24].mxu0 %vm860_vm1, %v1594_v61  ;;  %v3109_v61 = vld [vmem:[%s3839_s9 + $0x20] ss:$8 sps:$4 sm:$0xff]  }
 0x8ef   : > { %2904 = vmatprep.mubr.msk.bf16.mxu0 %vm3244_vm0, %v3242_v1  ;;  %2901 = vmatpush3.bf16.msra.mxu0 %v3095_v20 }
 0x8f0   : > { %2902 = vmatprep.subr.bf16.mxu0 %v3242_v1 }
 0x8f2   : > { %v2892_v36 = vpop.f32.mrb[10].mxu1 }
 0x8f3   : > { %v1749_v62 = vmul.f32 0.17677669, %v2892_v36  ;;  %v1739_v63 = vpop.f32.mrb[11].mxu1  ;;  %v3112_v36 = vld [vmem:[%s3840_s10 + $0x20] ss:$8 sps:$4 sm:$0xff]  }
 0x8f4   : > { %v1748_v0 = vmul.f32 0.17677669, %v1739_v63  ;;  %v3120_v63 = vld [vmem:[%s3840_s10 + $0x34] ss:$8 sps:$4 sm:$0xff]  }
 0x8f5   : > { %v1751_v2 = vsel %vm3531_vm6, %v1749_v62, -1e+30  ;;  %v3117_v62 = vld [vmem:[%s3839_s9 + $0x34] ss:$8 sps:$4 sm:$0xff]  }
 0x8f6   : > { %v1755_v3 = vsel %vm952_vm7, %v1751_v2, -inf  ;;  %v1750_v4 = vsel %vm3535_vm8, %v1748_v0, -1e+30  ;;  %v3115_v0 = vld [vmem:[%s3839_s9 + $0x30] ss:$8 sps:$4 sm:$0xff]  }
 0x8f7   : > { %1756 = vmax.xlane.f32.xlu1 %v1755_v3  ;;  %v1752_v5 = vsel %vm952_vm7, %v1750_v4, -inf  ;;  %v3123_v3 = vld [vmem:[%s3839_s9 + $0x44] ss:$8 sps:$4 sm:$0xff]  }
 0x8f8   : > { %1753 = vmax.xlane.f32.xlu0 %v1752_v5  ;;  %v3121_v5 = vld [vmem:[%s3839_s9 + $0x40] ss:$8 sps:$4 sm:$0xff]  }
 0x908   : > { %3053 = vrot.lane.b32.xlu1 %v3484_v14, %s3247_s14 }
 0x984   : > { %v1757_v6 = vpop.xlane.xlu1 %1756 }
 0x985   : > { %v1759_v7 = vsub.f32 %v1751_v2, %v1757_v6  ;;  %v1754_v8 = vpop.xlane.xlu0 %1753  ;;  %v3118_v2 = vld [vmem:[%s3840_s10 + $0x30] ss:$8 sps:$4 sm:$0xff]   ;;  %v3124_v6 = vld [vmem:[%s3840_s10 + $0x40] ss:$8 sps:$4 sm:$0xff]  }
 0x986   : > { %v1758_v9 = vsub.f32 %v1750_v4, %v1754_v8  ;;  %v3126_v4 = vld [vmem:[%s3840_s10 + $0x44] ss:$8 sps:$4 sm:$0xff]   ;;  %v3132_v8 = vld [vmem:[%s3840_s10 + $0x54] ss:$8 sps:$4 sm:$0xff]  }
 0x987   : > { %v1762_v10 = vmul.f32 1.442695, %v1759_v7  ;;  %v3129_v7 = vld [vmem:[%s3839_s9 + $0x54] ss:$8 sps:$4 sm:$0xff]  }
 0x988   : > { %v1760_v12 = vmul.f32 1.442695, %v1758_v9  ;;  %v3054_v51 = vpop.permute.xlu1 %3053  ;;  %v3127_v9 = vld [vmem:[%s3839_s9 + $0x50] ss:$8 sps:$4 sm:$0xff]  }
 0x989   : > { %v3056_v13 = vunpack.i.h.bf16 %v3054_v51  ;;  %v3055_v16 = vunpack.i.l.bf16 %v3054_v51  ;;  %v3138_v51 = vld [vmem:[%s3840_s10 + $0x64] ss:$8 sps:$4 sm:$0xff]  }
 0x98a   : > { %3189 = vpow2.f32 %v1760_v12  ;;  %v3135_v12 = vld [vmem:[%s3839_s9 + $0x64] ss:$8 sps:$4 sm:$0xff]  }
 0x98b   : > { %v3008_v17 = vpack.c.bf16 %v3056_v13, %v3055_v16  ;;  %3191 = vpow2.f32 %v1762_v10  ;;  %v3130_v10 = vld [vmem:[%s3840_s10 + $0x50] ss:$8 sps:$4 sm:$0xff]   ;;  %v3133_v13 = vld [vmem:[%s3839_s9 + $0x60] ss:$8 sps:$4 sm:$0xff]  }
 0x98c   : > { %v3136_v16 = vld [vmem:[%s3840_s10 + $0x60] ss:$8 sps:$4 sm:$0xff]  }
 0x98d   : > { %3009 = vmatprep.subr.bf16.mxu1 %v3008_v17 }
 0x98e   : > { %3011 = vmatpush3.bf16.msra.mxu1 %v3008_v17  ;;  %v3141_v17 = vld [vmem:[%s3839_s9 + $0x74] ss:$8 sps:$4 sm:$0xff]  }
 0x98f   : > { %2048 = vmatprep.subr.bf16.mxu1 %v3099_v41  ;;  %v3152_v41 = vld [vmem:[%s3841_s11 + $0x18] sm:$0xff]  }
 0x994   : > { %v3190_v54 = vpop.eup %3189 }
 0x995   : > { %v1764_v18 = vsel %vm952_vm7, %v3190_v54, 0.0  ;;  %v3192_v19 = vpop.eup %3191 }
 0x996   : > { %1765 = vadd.xlane.f32.xlu0 %v1764_v18  ;;  %v1767_v14 = vsel %vm952_vm7, %v3192_v19, 0.0  ;;  %v3139_v18 = vld [vmem:[%s3839_s9 + $0x70] ss:$8 sps:$4 sm:$0xff]  }
 0x99a   : > { %1768 = vadd.xlane.f32.xlu0 %v1767_v14 }
 0x9c1   : > { %v1648_v21 = vpop.f32.mrb[24].mxu0 }
 0x9c2   : > { %v1655_v22 = vadd.f32 %v1648_v21, %v3598_v11  ;;  %v2884_v23 = vpop.f32.mrb[25].mxu0  ;;  %v3096_v11 = vld [vmem:[%s3837_s7 + $0x38] sm:$0xff]  }
 0x9c3   : > { %v1651_v24 = vpop.f32.mrb[26].mxu0  ;;  %2903 = vmatpush3.bf16.msra.mxu0 %v3096_v11  ;;  %v3147_v11 = vld [vmem:[%s3841_s11 + $0x48] sm:$0xff]  }
 0x9c4   : > { %v1656_v25 = vadd.f32 %v1651_v24, %v3600_v15  ;;  %v2885_v27 = vpop.f32.mrb[27].mxu0  ;;  %2187 = vmatprep.subr.bf16.mxu0 %v3102_v42  ;;  %v3154_v42 = vld [vmem:[%s3841_s11 + $0x20] sm:$0xff]  }
 0xa23   : > { %v1766_v28 = vpop.xlane.xlu0 %1765 }
 0xa24   : > { %v1770_v29 = vmax.f32 %v1766_v28, 1e-30 }
 0xa26   : > { %3193 = vrcp.f32 %v1770_v29  ;;  %v2562_v29 = vld [vmem:[%s3838_s8] ss:$0 sm:$0xff] }
 0xa27   : > { %v1769_v30 = vpop.xlane.xlu0 %1768 }
 0xa28   : > { %v1771_v32 = vmax.f32 %v1769_v30, 1e-30 }
 0xa2a   : > { %3195 = vrcp.f32 %v1771_v32 }
 0xa30   : > { %v3194_v34 = vpop.eup %3193 }
 0xa31   : > { %v1774_v35 = vmul.f32 %v3194_v34, %v3190_v54  ;;  %v3144_v54 = vld [vmem:[%s3840_s10 + $0x74] ss:$8 sps:$4 sm:$0xff]  }
 0xa33   : > { %2897 = vmatprep.mubr.msk.f32.mxu1 %vm952_vm7, %v1774_v35 }
 0xa34   : > { %v3196_v38 = vpop.eup %3195 }
 0xa35   : > { %v1775_v1 = vmul.f32 %v3196_v38, %v3192_v19  ;;  %v3142_v19 = vld [vmem:[%s3840_s10 + $0x70] ss:$8 sps:$4 sm:$0xff]   ;;  %v3145_v38 = vld [vmem:[%s3841_s11 + $0x40] sm:$0xff]  }
 0xa37   : > { %2898 = vmatmul.mubr.msk.f32.vlgmr.msra.gmra.mrb[12].mxu1 %vm952_vm7, %v1775_v1  ;;  %v3146_v1 = vld [vmem:[%s3841_s11] sm:$0xff]  }
 0xa38   : > { %2080 = vmatprep.mubr.bf16.mxu1 %v3243_v26  ;;  %2049 = vmatpush1.bf16.msra.mxu1 %v3097_v33  ;;  %v3151_v33 = vld [vmem:[%s3841_s11 + $0x58] sm:$0xff]  }
 0xb0a   : > { %v2899_v15 = vpop.f32.mrb[12].mxu1 }
 0xb0b   : > { %v1854_v39 = vpop.f32.mrb[13].mxu1 }
 0xb0c   : > { %v1863_v40 = vpack.c.bf16 %v2899_v15, %v1854_v39  ;;  %v3148_v15 = vld [vmem:[%s3841_s11 + $0x8] sm:$0xff]   ;;  %v3149_v39 = vld [vmem:[%s3841_s11 + $0x50] sm:$0xff]  }
 0xb0e   : > { %2905 = vmatmul.mubr.msk.bf16.vlgmr.msra.gmra.mrb[28].mxu0 %vm860_vm1, %v1863_v40  ;;  %v3150_v40 = vld [vmem:[%s3841_s11 + $0x10] sm:$0xff]  }
 0xb0f   : > { %2219 = vmatprep.mubr.bf16.mxu0 %v3243_v26  ;;  %v3105_v26 = vld [vmem:[%s3839_s9 + $0x14] ss:$8 sps:$4 sm:$0xff]   ;;  %2188 = vmatpush1.bf16.msra.mxu0 %v3100_v31  ;;  %v3153_v31 = vld [vmem:[%s3841_s11 + $0x60] sm:$0xff]  }
 0xb10   : > { %2050 = vmatprep.subr.bf16.mxu1 %v3105_v26  ;;  %2189 = vmatprep.subr.bf16.mxu0 %v3108_v43  ;;  %v3155_v26 = vld [vmem:[%s3841_s11 + $0x68] sm:$0xff]  }
 0xb11   : > { %2051 = vmatpush1.bf16.msra.mxu1 %v3103_v44  ;;  %v3156_v43 = vld [vmem:[%s3841_s11 + $0x28] sm:$0xff]   ;;  %v3157_v44 = vld [vmem:[%s3841_s11 + $0x70] sm:$0xff]  }
 0xb12   : > { %2052 = vmatprep.subr.bf16.mxu1 %v3111_v59 }
 0xb13   : > { %2190 = vmatpush1.bf16.msra.mxu0 %v3106_v45  ;;  %v3158_v45 = vld [vmem:[%s3841_s11 + $0x30] sm:$0xff]  }
 0xb14   : > { %2191 = vmatprep.subr.bf16.mxu0 %v3114_v60 }
 0xb15   : > { %2053 = vmatpush1.bf16.msra.mxu1 %v3109_v61 }
 0xb16   : > { %2054 = vmatprep.subr.bf16.mxu1 %v3117_v62 }
 0xb17   : > { %2192 = vmatpush1.bf16.msra.mxu0 %v3112_v36 }
 0xb18   : > { %2193 = vmatprep.subr.bf16.mxu0 %v3120_v63 }
 0xb19   : > { %2055 = vmatpush1.bf16.msra.mxu1 %v3115_v0 }
 0xb1a   : > { %2056 = vmatprep.subr.bf16.mxu1 %v3123_v3 }
 0xb1b   : > { %2194 = vmatpush1.bf16.msra.mxu0 %v3118_v2 }
 0xb1c   : > { %2195 = vmatprep.subr.bf16.mxu0 %v3126_v4 }
 0xb1d   : > { %2057 = vmatpush1.bf16.msra.mxu1 %v3121_v5 }
 0xb1e   : > { %2058 = vmatprep.subr.bf16.mxu1 %v3129_v7 }
 0xb1f   : > { %2196 = vmatpush1.bf16.msra.mxu0 %v3124_v6 }
 0xb20   : > { %2197 = vmatprep.subr.bf16.mxu0 %v3132_v8 }
 0xb21   : > { %2059 = vmatpush1.bf16.msra.mxu1 %v3127_v9 }
 0xb22   : > { %2060 = vmatprep.subr.bf16.mxu1 %v3135_v12 }
 0xb23   : > { %2198 = vmatpush1.bf16.msra.mxu0 %v3130_v10 }
 0xb24   : > { %2199 = vmatprep.subr.bf16.mxu0 %v3138_v51 }
 0xb25   : > { %2061 = vmatpush1.bf16.msra.mxu1 %v3133_v13 }
 0xb26   : > { %2062 = vmatprep.subr.bf16.mxu1 %v3141_v17 }
 0xb27   : > { %2200 = vmatpush1.bf16.msra.mxu0 %v3136_v16 }
 0xb28   : > { %2201 = vmatprep.subr.bf16.mxu0 %v3144_v54 }
 0xb29   : > { %2063 = vmatpush1.bf16.msra.mxu1 %v3139_v18 }
 0xb2a   : > { %2708 = vmatprep.subr.bf16.mxu1 %v3145_v38 }
 0xb2b   : > { %2202 = vmatpush1.bf16.msra.mxu0 %v3142_v19 }
 0xbe1   : > { %v1917_v46 = vpop.f32.mrb[28].mxu0 }
 0xbe2   : > { %v1924_v47 = vadd.f32 %v1917_v46, %v1655_v22  ;;  %v2906_v48 = vpop.f32.mrb[29].mxu0  ;;  %v3159_v46 = vld [vmem:[%s3841_s11 + $0x78] sm:$0xff]  }
 0xbe3   : > { %v1920_v49 = vpop.f32.mrb[30].mxu0 }
 0xbe4   : > { %v3686_v37 = vadd.f32 %v3217_v50, %v1924_v47  ;;  %v1925_v52 = vadd.f32 %v1920_v49, %v1656_v25  ;;  %v2907_v53 = vpop.f32.mrb[31].mxu0  ;;  %v3160_v47 = vld [vmem:[%s3841_s11 + $0x38] sm:$0xff]  }
 0xbe6   : > { %v3689_v56 = vadd.f32 %v3218_v55, %v1925_v52  ;;  %v1928_v57 = vmul.f32 %v3686_v37, %v3686_v37 }
 0xbe8   : > { %1930 = vadd.xlane.f32.xlu0 %v1928_v57  ;;  %v1929_v58 = vmul.f32 %v3689_v56, %v3689_v56 }
 0xbec   : > { %1932 = vadd.xlane.f32.xlu0 %v1929_v58 }
 0xc75   : > { %v1931_v14 = vpop.xlane.xlu0 %1930 }
 0xc76   : > { %v1934_v20 = vmul.f32 0.0078125, %v1931_v14 }
 0xc78   : > { %v1936_v21 = vadd.f32 1e-06, %v1934_v20 }
 0xc79   : > { %v1933_v22 = vpop.xlane.xlu0 %1932 }
 0xc7a   : > { %3197 = vrsqrt.f32 %v1936_v21  ;;  %v1935_v23 = vmul.f32 0.0078125, %v1933_v22 }
 0xc7c   : > { %v1937_v24 = vadd.f32 1e-06, %v1935_v23 }
 0xc7e   : > { %3199 = vrsqrt.f32 %v1937_v24 }
 0xc84   : > { %v3198_v25 = vpop.eup %3197 }
 0xc85   : > { %v1940_v27 = vmul.f32 %v3198_v25, %v3686_v37 }
 0xc87   : > { %v1949_v32 = vmul.f32 %v2562_v29, %v1940_v27 }
 0xc88   : > { %v3200_v28 = vpop.eup %3199 }
 0xc89   : > { %v1941_v30 = vmul.f32 %v3200_v28, %v3689_v56 }
 0xc8b   : > { %v1950_v34 = vmul.f32 %v2562_v29, %v1941_v30 }
 0xc8d   : > { %v1951_v35 = vpack.c.bf16 %v1950_v34, %v1949_v32 }
 0xc8f   : > { %2081 = vmatmul.mubr.bf16.vlgmr.msra.gmra.mrb[16].mxu1 %v1951_v35  ;;  %2220 = vmatmul.mubr.bf16.vlgmr.msra.gmra.mrb[32].mxu0 %v1951_v35 }
 0xc90   : > { %2709 = vmatpush3.bf16.msra.mxu1 %v3146_v1 }
 0xc91   : > { %2710 = vmatprep.subr.bf16.mxu1 %v3147_v11 }
 0xc94   : > { %2711 = vmatpush3.bf16.msra.mxu1 %v3148_v15 }
 0xc95   : > { %2712 = vmatprep.subr.bf16.mxu1 %v3149_v39 }
 0xc98   : > { %2713 = vmatpush3.bf16.msra.mxu1 %v3150_v40 }
 0xc99   : > { %2714 = vmatprep.subr.bf16.mxu1 %v3151_v33 }
 0xc9c   : > { %2715 = vmatpush3.bf16.msra.mxu1 %v3152_v41 }
 0xc9d   : > { %2716 = vmatprep.subr.bf16.mxu1 %v3153_v31 }
 0xca0   : > { %2717 = vmatpush3.bf16.msra.mxu1 %v3154_v42 }
 0xca1   : > { %2718 = vmatprep.subr.bf16.mxu1 %v3155_v26 }
 0xca4   : > { %2719 = vmatpush3.bf16.msra.mxu1 %v3156_v43 }
 0xca5   : > { %2720 = vmatprep.subr.bf16.mxu1 %v3157_v44 }
 0xca8   : > { %2721 = vmatpush3.bf16.msra.mxu1 %v3158_v45 }
 0xca9   : > { %2722 = vmatprep.subr.bf16.mxu1 %v3159_v46 }
 0xcac   : > { %2723 = vmatpush3.bf16.msra.mxu1 %v3160_v47 }
 0xd62   : > { %v2082_v48 = vpop.f32.mrb[16].mxu1  ;;  %v2221_v49 = vpop.f32.mrb[32].mxu0 }
 0xd63   : > { %v2595_v50 = vmul.f32 -1.442695, %v2082_v48  ;;  %v2084_v52 = vpop.f32.mrb[17].mxu1  ;;  %v2223_v53 = vpop.f32.mrb[33].mxu0 }
 0xd64   : > { %v2596_v55 = vmul.f32 -1.442695, %v2084_v52  ;;  %v2086_v57 = vpop.f32.mrb[18].mxu1  ;;  %v2225_v58 = vpop.f32.mrb[34].mxu0 }
 0xd65   : > { %3201 = vpow2.f32 %v2595_v50  ;;  %v2597_v59 = vmul.f32 -1.442695, %v2086_v57  ;;  %v2088_v60 = vpop.f32.mrb[19].mxu1  ;;  %v2227_v61 = vpop.f32.mrb[35].mxu0 }
 0xd66   : > { %3203 = vpow2.f32 %v2596_v55  ;;  %v2598_v36 = vmul.f32 -1.442695, %v2088_v60 }
 0xd67   : > { %3205 = vpow2.f32 %v2597_v59 }
 0xd68   : > { %3207 = vpow2.f32 %v2598_v36 }
 0xd6f   : > { %v3202_v62 = vpop.eup %3201 }
 0xd70   : > { %v3204_v63 = vpop.eup %3203  ;;  %v2242_v0 = vadd.f32 1.0, %v3202_v62 }
 0xd71   : > { %v3206_v2 = vpop.eup %3205  ;;  %v2243_v3 = vadd.f32 1.0, %v3204_v63 }
 0xd72   : > { %v3208_v4 = vpop.eup %3207  ;;  %3209 = vrcp.f32 %v2242_v0  ;;  %v2244_v5 = vadd.f32 1.0, %v3206_v2 }
 0xd73   : > { %3211 = vrcp.f32 %v2243_v3  ;;  %v2245_v6 = vadd.f32 1.0, %v3208_v4 }
 0xd74   : > { %3213 = vrcp.f32 %v2244_v5 }
 0xd75   : > { %3215 = vrcp.f32 %v2245_v6 }
 0xd7c   : > { %v3210_v7 = vpop.eup %3209 }
 0xd7d   : > { %v3212_v8 = vpop.eup %3211  ;;  %v2254_v9 = vmul.f32 %v3210_v7, %v2082_v48 }
 0xd7e   : > { %v3214_v10 = vpop.eup %3213  ;;  %v2255_v12 = vmul.f32 %v3212_v8, %v2084_v52 }
 0xd7f   : > { %v3216_v51 = vpop.eup %3215  ;;  %v2258_v13 = vmul.f32 %v2254_v9, %v2221_v49  ;;  %v2256_v16 = vmul.f32 %v3214_v10, %v2086_v57 }
 0xd80   : > { %v2259_v17 = vmul.f32 %v2255_v12, %v2223_v53  ;;  %v2257_v54 = vmul.f32 %v3216_v51, %v2088_v60 }
 0xd81   : > { %v2260_v18 = vmul.f32 %v2256_v16, %v2225_v58 }
 0xd82   : > { %v2261_v19 = vmul.f32 %v2257_v54, %v2227_v61 }
 0xd83   : > { %v2262_v14 = vpack.c.bf16 %v2260_v18, %v2258_v13 }
 0xd84   : > { %v2263_v20 = vpack.c.bf16 %v2261_v19, %v2259_v17 }
 0xd86   : > { %2424 = vmatprep.mubr.bf16.mxu1 %v2263_v20 }
 0xd87   : > { %2425 = vmatmul.mubr.bf16.vlgmr.msra.gmra.mrb[20].mxu1 %v2262_v14 }
 0xe5a   : > { %v2724_v21 = vpop.f32.mrb[20].mxu1 }
 0xe5b   : > { %v2725_v22 = vpop.f32.mrb[21].mxu1 }
 0xe5c   : > { %v2726_v23 = vadd.f32 %v2725_v22, %v2724_v21  ;;  %v2727_v24 = vpop.f32.mrb[22].mxu1 }
 0xe5d   : > { %v2728_v25 = vpop.f32.mrb[23].mxu1 }
 0xe5e   : > { %v2433_v27 = vadd.f32 %v2726_v23, %v3686_v37  ;;  %v2729_v28 = vadd.f32 %v2728_v25, %v2727_v24 }
 0xe60   : > { %2435 = vst [vmem:[%s393_s30] sm:$0xff] %v2433_v27  ;;  %v2434_v29 = vadd.f32 %v2729_v28, %v3689_v56 }
 0xe62   : > { %2436 = vst [vmem:[%s393_s30 + $0x8] sm:$0xff] %v2434_v29 }
 0xe63 PF: > { %s28_s26 = sadd.s32 1, %s3239_s26  }
 0xe64   : > { %p25_p9 = scmp.ge.s32.totalorder %s28_s26, 4  }
 0xe66   :  { %27 = sbr.rel (!%p25_p9) target bundleno = 16 (0x10), region = 94 }

</bundles_post_ra>
